<compile_context>
chip_gen: v6e
topology: v6e:2x2x1
jax: 0.10.0
libtpu: 0.0.40
codegen_flags: <defaults>
</compile_context>

<pallas_src>
import math

import jax
import jax.numpy as jnp
from jax.experimental import pallas as pl
from jax.experimental.pallas import tpu as pltpu


_TARGET_BLOCK_BYTES = 4 * 1024 * 1024     # in+out bytes per grid step (padded)
_MAX_BLOCK_BYTES = 8 * 1024 * 1024        # hard cap per grid step
_VMEM_LIMIT_BYTES = 48 * 1024 * 1024      # < v7x 64 MiB physical, > scoped defaults
_MIN_PALLAS_BYTES = 1 * 1024 * 1024       # below this XLA's fused transpose wins
_MIN_DMA_RUN_BYTES = 512                  # strided-read contiguous-run floor
_MIN_COPY_BLOCK_BYTES = 256 * 1024        # copy path needs slabs big enough to
                                          # amortize ~0.35us per grid step
_MIN_GRID_STEPS = 4                       # keep both v7x TCs busy / pipeline


# --------------------------------------------------------------------------- #
# Small helpers
# --------------------------------------------------------------------------- #
def _round_up(v, m):
    return -(-v // m) * m


def _divisors(extent):
    divs = set()
    d = 1
    while d * d <= extent:
        if extent % d == 0:
            divs.add(d)
            divs.add(extent // d)
        d += 1
    return sorted(divs)


def _choose_tile(extent, bytes_per_unit, align, min_steps):
    """Largest aligned divisor of `extent` under the block budget, preferring
    enough grid steps for megacore sharding / pipeline overlap."""
    cands = [d for d in _divisors(extent) if d == extent or d % align == 0]
    in_target = [d for d in cands if d * bytes_per_unit <= _TARGET_BLOCK_BYTES]
    if in_target:
        for steps in (max(min_steps, 1), 2, 1):
            good = [d for d in in_target if extent // d >= steps]
            if good:
                return max(good)
    in_max = [d for d in cands if d * bytes_per_unit <= _MAX_BLOCK_BYTES]
    if in_max:
        return min(in_max)
    return None


def _drop_unit_dims(shape, axes):
    """Remove size-1 dims from the permutation (pure metadata)."""
    keep = [a for a in range(len(shape)) if shape[a] != 1]
    if len(keep) == len(shape):
        return tuple(shape), tuple(axes)
    pos = {a: i for i, a in enumerate(keep)}
    new_axes = tuple(pos[a] for a in axes if shape[a] != 1)
    new_shape = tuple(shape[a] for a in keep)
    return new_shape, new_axes


def _canonicalize(shape, axes):
    """Merge input-adjacent dims that stay adjacent (same order) in the output.

    Returns (canonical_shape, canonical_axes); both the input reshape to
    canonical_shape and the final reshape of the permuted canonical output to
    the true output shape are free (contiguous regroupings)."""
    groups = []                       # groups of input axes, in OUTPUT order
    for a in axes:
        if groups and a == groups[-1][-1] + 1:
            groups[-1].append(a)
        else:
            groups.append([a])
    order = sorted(range(len(groups)), key=lambda g: groups[g][0])
    canon_id = {}
    canon_shape = []
    for ci, gi in enumerate(order):
        canon_id[gi] = ci
        canon_shape.append(math.prod(shape[a] for a in groups[gi]))
    canon_axes = tuple(canon_id[gi] for gi in range(len(groups)))
    return tuple(canon_shape), canon_axes


def _relayout_in_bytes_per_unit(cs, a0, itemsize):
    """Padded VMEM bytes of the relayout input block per unit of the tile."""
    n = len(cs)
    total = itemsize
    for d in range(n):
        if d == a0:
            continue
        e = cs[d]
        if d == n - 1:
            e = _round_up(e, 128)
        elif d == n - 2:
            e = _round_up(e, 8)
        total *= e
    return total


# --------------------------------------------------------------------------- #
# Kernels
# --------------------------------------------------------------------------- #
def _copy_kernel(x_ref, o_ref):
    # Pure data movement: both refs are the same (tile, F) slab; the whole
    # permutation lives in the BlockSpec index maps (no XLU work).
    o_ref[...] = x_ref[...]


def _make_relayout_kernel(axes, out_block):
    def kernel(x_ref, o_ref):
        # XLU relayout of the VMEM tile, then a dense lane-aligned store into
        # the flattened output slab.
        o_ref[...] = jnp.transpose(x_ref[...], axes).reshape(out_block)
    return kernel


def _make_relayout_in_map(a0, n):
    def imap(i):
        return tuple(i if d == a0 else 0 for d in range(n))
    return imap


# --------------------------------------------------------------------------- #
# Pallas paths
# --------------------------------------------------------------------------- #
def _permute_copy_path(x_c, cs, ax, out_shape):
    """Pure-DMA permute for canonical permutations with ax[-1] == ndim-1."""
    n = len(cs)
    itemsize = jnp.dtype(x_c.dtype).itemsize
    F = cs[-1]
    tdim = ax[n - 2]                       # input dim that becomes out dim n-2
    lead = ax[:n - 2]                      # out dims 0..n-3 -> input dims
    out_pos = {d: k for k, d in enumerate(lead)}
    mids = tuple(range(tdim + 1, n - 1))   # input dims folded into the G axis

    # Collapse everything right of tdim into one lane-dense axis (free).
    G = math.prod(cs[tdim + 1:])
    in_view = tuple(cs[:tdim + 1]) + (G,)

    other_steps = math.prod(cs[d] for d in lead) if lead else 1
    per_unit = 2 * _round_up(F, 128) * itemsize         # in + out per tile unit
    min_steps = max(1, -(-_MIN_GRID_STEPS // other_steps))
    tile = _choose_tile(cs[tdim], per_unit, 8, min_steps)
    if tile is None:
        return None

    grid = tuple(cs[d] for d in lead) + (cs[tdim] // tile,)
    n_grid = len(grid)

    in_block = (None,) * tdim + (tile, F)

    def in_map(*g):
        idx = [g[out_pos[d]] for d in range(tdim)]       # dims left of tdim
        idx.append(g[n_grid - 1])                        # tile index of tdim
        flat = 0
        for d in mids:                                   # row-major middle fold
            flat = flat * cs[d] + g[out_pos[d]]
        idx.append(flat)                                 # block index along G
        return tuple(idx)

    out_shape_c = tuple(cs[d] for d in ax)
    out_block = (None,) * (n - 2) + (tile, F)

    def out_map(*g):
        return tuple(g[:n_grid - 1]) + (g[n_grid - 1], 0)

    total_bytes = x_c.size * itemsize
    y = pl.pallas_call(
        _copy_kernel,
        out_shape=jax.ShapeDtypeStruct(out_shape_c, x_c.dtype),
        grid=grid,
        in_specs=[pl.BlockSpec(in_block, in_map)],
        out_specs=pl.BlockSpec(out_block, out_map),
        compiler_params=pltpu.CompilerParams(
            dimension_semantics=("parallel",) * n_grid,
            vmem_limit_bytes=_VMEM_LIMIT_BYTES),
        cost_estimate=pl.CostEstimate(
            flops=0, transcendentals=0, bytes_accessed=2 * total_bytes),
    )(x_c.reshape(in_view))
    return y.reshape(out_shape)


def _permute_relayout_path(x_c, cs, ax, out_shape):
    """General permute: tiled in-VMEM transpose + lane-dense flat output."""
    n = len(cs)
    itemsize = jnp.dtype(x_c.dtype).itemsize
    a0 = ax[0]                   # input axis that becomes output axis 0
    s0 = cs[a0]
    rest = x_c.size // s0

    # Strided-read sanity: each HBM run is prod(cs[a0+1:]) elements.
    if a0 not in (0, n - 1):
        run_bytes = math.prod(cs[a0 + 1:]) * itemsize
        if run_bytes < _MIN_DMA_RUN_BYTES:
            return None          # descriptor-bound strided reads: let XLA do it

    in_unit = _relayout_in_bytes_per_unit(cs, a0, itemsize)
    out_unit = _round_up(rest, 128) * itemsize
    align = 128 if a0 == n - 1 else 8
    tile = _choose_tile(s0, in_unit + out_unit, align, _MIN_GRID_STEPS)
    if tile is None:
        # TODO(synk): second-level tiling along ax[1] (2-D grid) for
        # permutations whose single-row slab exceeds the VMEM budget.
        return None

    grid = (s0 // tile,)
    in_block = tuple(tile if d == a0 else cs[d] for d in range(n))
    out_block = (tile, rest)
    total_bytes = x_c.size * itemsize

    flat = pl.pallas_call(
        _make_relayout_kernel(ax, out_block),
        out_shape=jax.ShapeDtypeStruct((s0, rest), x_c.dtype),
        grid=grid,
        in_specs=[pl.BlockSpec(in_block, _make_relayout_in_map(a0, n))],
        out_specs=pl.BlockSpec(out_block, lambda i: (i, 0)),
        compiler_params=pltpu.CompilerParams(
            dimension_semantics=("parallel",),
            vmem_limit_bytes=_VMEM_LIMIT_BYTES),
        cost_estimate=pl.CostEstimate(
            flops=0, transcendentals=0, bytes_accessed=2 * total_bytes),
    )(x_c)
    # Contiguous (free) reshape from the lane-dense slab to the permuted shape.
    return flat.reshape(out_shape)


# --------------------------------------------------------------------------- #
# Wrapper
# --------------------------------------------------------------------------- #
def permute_pallas(x, axes, *, force_pallas=False):
    """Pallas equivalent of torch.Tensor.permute(axes)."""
    axes = tuple(int(a) for a in axes)
    ndim = x.ndim
    assert len(axes) == ndim and sorted(axes) == list(range(ndim))

    out_shape = tuple(x.shape[a] for a in axes)
    if axes == tuple(range(ndim)) or ndim < 2 or x.size == 0:
        return jnp.transpose(x, axes)            # identity / degenerate

    itemsize = jnp.dtype(x.dtype).itemsize
    total_bytes = x.size * itemsize
    if not force_pallas and total_bytes < _MIN_PALLAS_BYTES:
        return jnp.transpose(x, axes)            # launch overhead dominates

    # Canonicalize: drop size-1 dims, merge adjacency-preserving dim runs.
    shape2, axes2 = _drop_unit_dims(x.shape, axes)
    if len(axes2) < 2 or axes2 == tuple(range(len(axes2))):
        return x.reshape(out_shape)              # only size-1 dims moved: free
    cs, ax = _canonicalize(shape2, axes2)
    if len(ax) < 2 or ax == tuple(range(len(ax))):
        return x.reshape(out_shape)

    x_c = x.reshape(cs)                          # free contiguous regrouping

    # Copy path: trailing canonical axis fixed -> permutation is pure DMA.
    if (ax[-1] == len(ax) - 1
            and cs[-1] % 128 == 0
            and cs[-1] * itemsize >= _MIN_DMA_RUN_BYTES
            and cs[ax[-2]] * cs[-1] * itemsize >= _MIN_COPY_BLOCK_BYTES):
        y = _permute_copy_path(x_c, cs, ax, out_shape)
        if y is not None:
            return y

    y = _permute_relayout_path(x_c, cs, ax, out_shape)
    if y is not None:
        return y
    return jnp.transpose(x, axes)                # VMEM/alignment fallback


class PermuteLayer:
    """JAX/Pallas mirror of the PyTorch PermuteLayer module (no parameters)."""

    def __init__(self, axes):
        self.axes = tuple(axes)

    def __call__(self, x, *, force_pallas=False):
        return permute_pallas(x, self.axes, force_pallas=force_pallas)


if __name__ == "__main__":
    key = jax.random.PRNGKey(0)

    # Canonical voxception-style use: NCHW -> NHWC on a small activation.
    axes = (0, 2, 3, 1)
    x = jax.random.normal(key, (2, 4, 16, 16), dtype=jnp.float32)
    layer = PermuteLayer(axes)
    y_ref = jnp.transpose(x, axes)

    # 1) Relayout path (forced past the small-input XLA bypass); canonical
    #    input is the lane-dense (2, 4, 256) view.
    y = jax.block_until_ready(layer(x, force_pallas=True))
    assert y.shape == (2, 16, 16, 4) and y.dtype == x.dtype
    assert bool(jnp.array_equal(y, y_ref))

    # 2) Default dispatch on the tiny input (XLA fast path).
    assert bool(jnp.array_equal(jax.block_until_ready(layer(x)), y_ref))

    # 3) Relayout path with the tiled axis in the middle (strided input reads
    #    with 512 B contiguous runs), forced.
    axes2 = (2, 0, 1, 3)
    x2 = jax.random.normal(jax.random.fold_in(key, 1), (2, 4, 16, 128),
                           dtype=jnp.float32)
    y2 = jax.block_until_ready(permute_pallas(x2, axes2, force_pallas=True))
    assert bool(jnp.array_equal(y2, jnp.transpose(x2, axes2)))

    # 4) Pure-DMA copy path: (seq, heads, head_dim) -> (heads, seq, head_dim);
    #    kernel body is a plain copy, permutation lives in the index maps.
    x3 = jax.random.normal(jax.random.fold_in(key, 2), (1024, 8, 128),
                           dtype=jnp.float32)
    y3 = jax.block_until_ready(permute_pallas(x3, (1, 0, 2)))
    assert bool(jnp.array_equal(y3, jnp.transpose(x3, (1, 0, 2))))

    # 5) Multi-step tiled relayout on a larger NCHW activation (grid=(4,)).
    x4 = jax.random.normal(jax.random.fold_in(key, 3), (32, 8, 32, 128),
                           dtype=jnp.float32)
    y4 = jax.block_until_ready(permute_pallas(x4, axes))
    assert bool(jnp.array_equal(y4, jnp.transpose(x4, axes)))

    print("KERNEL_OK")
</pallas_src>

<mosaic_0001>
module attributes {stable_mosaic.version = 11 : i64} {
  func.func @kernel(%arg0: i32, %arg1: memref<2x4x256xf32, #tpu.memory_space<vmem>>, %arg2: memref<2x1024xf32, #tpu.memory_space<vmem>>) attributes {dimension_semantics = [#tpu.dimension_semantics<parallel>], iteration_bounds = array<i64: 1>, scalar_prefetch = 0 : i64, scratch_operands = 0 : i64, tpu.core_type = #tpu.core_type<tc>, window_params = [{transform_indices = @transform_0, window_bounds = array<i64: 2, 4, 256>}, {transform_indices = @transform_1, window_bounds = array<i64: 2, 1024>}]} {
    %c0 = arith.constant 0 : index
    %c0_0 = arith.constant 0 : index
    %c0_1 = arith.constant 0 : index
    %0 = vector.load %arg1[%c0, %c0_0, %c0_1] : memref<2x4x256xf32, #tpu.memory_space<vmem>>, vector<2x4x256xf32>
    %1 = tpu.transpose %0, [0, 2, 1] : vector<2x4x256xf32> -> vector<2x256x4xf32>
    %2 = vector.shape_cast %1 : vector<2x256x4xf32> to vector<2x1024xf32>
    %c0_2 = arith.constant 0 : index
    %c0_3 = arith.constant 0 : index
    %3 = vector.load %arg2[%c0_2, %c0_3] : memref<2x1024xf32, #tpu.memory_space<vmem>>, vector<2x1024xf32>
    tpu.vector_store %arg2[%c0_2, %c0_3], %2 {strides = array<i32>} : memref<2x1024xf32, #tpu.memory_space<vmem>>, vector<2x1024xf32>,
    return
  }
  func.func @transform_0(%arg0: i32) -> (i32, i32, i32) {
    %c0_i32 = arith.constant 0 : i32
    %c0_i32_0 = arith.constant 0 : i32
    %c0_i32_1 = arith.constant 0 : i32
    return %arg0, %c0_i32, %c0_i32_0 : i32, i32, i32
  }
  func.func @transform_1(%arg0: i32) -> (i32, i32) {
    %c0_i32 = arith.constant 0 : i32
    %c0_i32_0 = arith.constant 0 : i32
    return %arg0, %c0_i32 : i32, i32
  }
}

</mosaic_0001>

<bundles_post_ra>
// kernel: tpu_custom_call.1
= control target key start
LH: loop header
LB: loop body
LE: loop exit
PB: predicated region body
PF: predicated region fallthrough
CT: control target
= control target key end

     0   :  { %6 = vsyncpa [#allocation3], 0  ;;  %s5272_s0 = inlined_call_operand.hbm [shape: f32[2,4,256], index: 0, kind: input, shape index: {}]   ;;  %s5273_s1 = inlined_call_operand.hbm [shape: f32[2,1024], index: 1, kind: output, shape index: {}]  }
   0x1   :  { %7 = vsyncpa [#allocation4], 0  ;;  %s3686_s6 = smov [#allocation2]  }
   0x2   :  { %s13_s7 = sshll.u32 %s3686_s6, 4  ;;  %s14_s7 = int_to_ptr.vmem [resolvable:$true] %s13_s7 }
   0x3   :  { %s3650_s8 = scalar_lea.vmem %s14_s7, 256  ;;  %p3655_p1 = scmp.lt.s32.totalorder %s14_s7, %s14_s7 }
   0x4   :  { %p3651_p0 = scmp.ne.s32.totalorder %s14_s7, %s3650_s8  ;;  %p3656_p2 = scmp.lt.s32.totalorder %s3650_s8, %s3650_s8 }
   0x6   :  { %p3657_p3 = por %p3656_p2, %p3655_p1 }
   0x8   :  { %p3658_p4 = pnand %p3657_p3, %p3651_p0 }
   0xa   :  { %3661 = shalt.err (!%p3658_p4)
}
   0xb   :  { %s3687_s9 = smov 128   ;;  %s3688_s10 = smov 8  }
   0xc   :  { %19 = dma.hbm_to_vmem [thread:$0]  %s5272_s0, 256, %s14_s7, [#allocation3], %s3687_s9, %s3687_s9, %s3688_s10  }
   0xd   :  { %3682 = dma.done.wait [#allocation3], 256  }
   0xe   :  { %3683 = vsyncadd [#allocation3], 4294967040  ;;  %v24_v0 = vld [vmem:[#allocation2 + $0x8] sm:$0xff]  ;;  %v23_v1 = vld [vmem:[#allocation2] sm:$0xff]  ;;  %v3689_v8 = vmov 1983009808   ;;  %v163_v10 = vlaneseq }
   0xf   :  { %95 = vxpose.xlu1.b32.start.end [1/1] (short) %v24_v0, 128  ;;  %31 = vxpose.xlu0.b32.start.end [1/1] (short) %v23_v1, 128  ;;  %v28_v2 = vcombine.high %v24_v0, %v24_v0  ;;  %v27_v3 = vcombine.high %v23_v1, %v23_v1  ;;  %v161_v9 = vunpack.c.l.s4 %v3689_v8  ;;  %v3690_v18 = vmov 1934713408   ;;  %s3692_s0 = smov 12   ;;  %s3693_s13 = smov 16  }
  0x10   :  { %v164_v14 = vshrl.u32 %v163_v10, 7  ;;  %v192_v19 = vunpack.c.l.s4 %v3690_v18  ;;  %v3691_v27 = vmov 0.0   ;;  %s3694_s14 = smov 4   ;;  %s3695_s15 = smov 20   ;;  %vm3263_vm0 = vcmask 31744  }
  0x11   :  { %v162_v13 = vunpack.c.0.s8 %v161_v9  ;;  %s3696_s16 = smov 24   ;;  %s3697_s17 = smov 28   ;;  %vm3265_vm1 = vcmask 64512   ;;  %vm3267_vm2 = vcmask 97280   ;;  %vm3269_vm3 = vcmask 130048  }
  0x12   :  { %v193_v24 = vunpack.c.0.s8 %v192_v19  ;;  %s3698_s18 = smov 32   ;;  %s3699_s19 = smov 36   ;;  %vm3271_vm4 = vcmask 162816   ;;  %vm3273_vm5 = vcmask 195584   ;;  %vm5327_vm6 = vcmask 228352  }
  0x13   :  { %v3745_v17 = vsub.s32 %v162_v13, %v164_v14  ;;  %s3700_s20 = smov 40   ;;  %s3701_s21 = smov 44   ;;  %vm5322_vm7 = vcmask 261120   ;;  %vm5324_vm8 = vcmask 293888   ;;  %vm5323_vm9 = vcmask 326656  }
  0x14   :  { %v3759_v31 = vsub.s32 %v193_v24, %v164_v14  ;;  %s3702_s22 = smov 48   ;;  %s3703_s23 = smov 52   ;;  %vm5305_vm10 = vcmask 359424   ;;  %vm5307_vm11 = vcmask 392192   ;;  %vm5306_vm12 = vcmask 424960  }
  0x15   :  { %s5311_s24 = smov 56   ;;  %s5303_s25 = smov 60   ;;  %vm5309_vm13 = vcmask 457728   ;;  %vm5308_vm14 = vcmask 490496   ;;  %vm5315_vm15 = vcmask 523264  }
  0x16   :  { %s3706_s26 = smov 64   ;;  %s3707_s27 = smov 68  }
  0x17   :  { %s5300_s28 = smov 72   ;;  %s3709_s29 = smov 76  }
  0x18   :  { %s3710_s30 = smov 80   ;;  %s5296_s2 = smov 84  }
  0x19   :  { %s3712_s3 = smov 88   ;;  %s3713_s4 = smov 92  }
  0x1a   :  { %s5279_s5 = smov 96   ;;  %s3715_s6 = smov 100  }
  0x1b   :  { %s3716_s7 = smov 104   ;;  %s3717_s8 = smov 108  }
  0x1c   :  { %s5274_s9 = smov 112   ;;  %s3719_s11 = smov 116  }
  0x1d   :  { %s3720_s12 = smov 120  }
  0x4c   :  { %127 = vxpose.xlu1.b32.start.end [1/1] (short) %v28_v2, 128  ;;  %63 = vxpose.xlu0.b32.start.end [1/1] (short) %v27_v3, 128 }
  0x8b   :  { %v111_v4 = vpop.trf.xlu1  ;;  %v47_v5 = vpop.trf.xlu0 }
  0x8c   :  { %v181_v22 = vrot.slane %v111_v4, %v3745_v17  ;;  %v166_v23 = vrot.slane %v47_v5, %v3745_v17  ;;  %v174_v28 = vcombine.high %v111_v4, %v3691_v27  ;;  %v159_v29 = vcombine.high %v47_v5, %v3691_v27 }
  0x8e   :  { %v190_v30 = vcombine.high %v166_v23, %v181_v22  ;;  %v188_v34 = vrot.slane %v174_v28, %v3745_v17  ;;  %v173_v35 = vrot.slane %v159_v29, %v3745_v17  ;;  %v189_v37 = vcombine.low %v166_v23, %v181_v22 }
  0x8f   :  { %v112_v6 = vpop.trf.xlu1  ;;  %v48_v7 = vpop.trf.xlu0 }
  0x90   :  { %v204_v36 = vrot.slane %v190_v30, %v3759_v31  ;;  %v205_v41 = vcombine.low %v173_v35, %v188_v34  ;;  %v3776_v42 = vrot.slane %v189_v37, %v3759_v31  ;;  %v247_v45 = vrot.slane %v112_v6, %v3745_v17 }
  0x91   :  { %v232_v46 = vrot.slane %v48_v7, %v3745_v17  ;;  %v206_v48 = vcombine.high %v173_v35, %v188_v34  ;;  %v240_v49 = vcombine.high %v112_v6, %v3691_v27  ;;  %v225_v53 = vcombine.high %v48_v7, %v3691_v27 }
  0x92   :  { %v222_v40 = vcombine.high %v204_v36, %v3691_v27  ;;  %v213_v47 = vrot.slane %v205_v41, %v3759_v31  ;;  %v221_v50 = vcombine.high %v3776_v42, %v3691_v27 }
  0x93   :  { %v3737_v11 = vpop.trf.xlu1  ;;  %v3739_v12 = vpop.trf.xlu0  ;;  %v255_v54 = vcombine.low %v232_v46, %v247_v45  ;;  %v220_v56 = vrot.slane %v206_v48, %v3759_v31  ;;  %v254_v57 = vrot.slane %v240_v49, %v3745_v17  ;;  %v239_v60 = vrot.slane %v225_v53, %v3745_v17 }
  0x94   :  { %v223_v55 = vcombine.high %v213_v47, %v3691_v27  ;;  %v256_v61 = vcombine.high %v232_v46, %v247_v45  ;;  %v313_v5 = vrot.slane %v3737_v11, %v3745_v17  ;;  %v298_v8 = vrot.slane %v3739_v12, %v3745_v17 }
  0x95   :  { %v224_v62 = vcombine.high %v220_v56, %v3691_v27  ;;  %v263_v63 = vrot.slane %v255_v54, %v3759_v31  ;;  %v271_v4 = vcombine.low %v239_v60, %v254_v57  ;;  %v272_v13 = vcombine.high %v239_v60, %v254_v57 }
  0x96   :  { %v270_v3 = vrot.slane %v256_v61, %v3759_v31  ;;  %v306_v14 = vcombine.high %v3737_v11, %v3691_v27  ;;  %v291_v22 = vcombine.high %v3739_v12, %v3691_v27  ;;  %v321_v23 = vcombine.low %v298_v8, %v313_v5 }
  0x97   :  { %v3741_v15 = vpop.trf.xlu1  ;;  %v3743_v16 = vpop.trf.xlu0  ;;  %v287_v2 = vcombine.high %v263_v63, %v3691_v27  ;;  %v279_v10 = vrot.slane %v271_v4, %v3759_v31  ;;  %v286_v28 = vrot.slane %v272_v13, %v3759_v31  ;;  %v322_v12 = vcombine.high %v298_v8, %v313_v5 }
  0x98   :  { %v288_v9 = vcombine.high %v270_v3, %v3691_v27  ;;  %v320_v11 = vrot.slane %v306_v14, %v3745_v17  ;;  %v305_v34 = vrot.slane %v291_v22, %v3745_v17  ;;  %v357_v61 = vcombine.high %v3743_v16, %v3691_v27 }
  0x99   :  { %v289_v24 = vcombine.high %v279_v10, %v3691_v27  ;;  %v290_v35 = vcombine.high %v286_v28, %v3691_v27  ;;  %v336_v45 = vrot.slane %v322_v12, %v3759_v31 }
  0x9a   :  { %v337_v46 = vcombine.low %v305_v34, %v320_v11  ;;  %v371_v5 = vrot.slane %v357_v61, %v3745_v17 }
  0x9b   :  { %v3747_v20 = vpop.trf.xlu1  ;;  %v3749_v21 = vpop.trf.xlu0  ;;  %v354_v53 = vcombine.high %v336_v45, %v3691_v27 }
  0x9c   :  { %v345_v54 = vrot.slane %v337_v46, %v3759_v31 }
  0x9f   :  { %v3753_v25 = vpop.trf.xlu1  ;;  %v3755_v26 = vpop.trf.xlu0 }
  0xa3   :  { %v3761_v32 = vpop.trf.xlu1  ;;  %v3763_v33 = vpop.trf.xlu0 }
  0xa6   :  { %2276 = vrot.lane.b32.xlu1 %v204_v36, %s3688_s10  ;;  %v329_v36 = vrot.slane %v321_v23, %v3759_v31 }
  0xa7   :  { %v3769_v38 = vpop.trf.xlu1  ;;  %v3771_v39 = vpop.trf.xlu0 }
  0xa8   :  { %v353_v41 = vcombine.high %v329_v36, %v3691_v27 }
  0xaa   :  { %2280 = vrot.lane.b32.xlu1 %v222_v40, %s3692_s0 }
  0xab   :  { %v3778_v43 = vpop.trf.xlu1  ;;  %v3780_v44 = vpop.trf.xlu0 }
  0xae   :  { %2284 = vrot.lane.b32.xlu1 %v213_v47, %s3693_s13  ;;  %v379_v47 = vrot.slane %v3741_v15, %v3745_v17 }
  0xaf   :  { %v3789_v51 = vpop.trf.xlu1  ;;  %v3791_v52 = vpop.trf.xlu0 }
  0xb1   :  { %2272 = vrot.lane.b32.xlu0 %v221_v50, %s3694_s14  ;;  %v364_v50 = vrot.slane %v3743_v16, %v3745_v17 }
  0xb2   :  { %2288 = vrot.lane.b32.xlu1 %v223_v55, %s3695_s15  ;;  %v338_v55 = vcombine.high %v305_v34, %v320_v11 }
  0xb3   :  { %v3799_v58 = vpop.trf.xlu1  ;;  %v3801_v59 = vpop.trf.xlu0  ;;  %v388_v16 = vcombine.high %v364_v50, %v379_v47 }
  0xb5   :  { %2292 = vrot.lane.b32.xlu0 %v220_v56, %s3696_s16  ;;  %v372_v56 = vcombine.high %v3741_v15, %v3691_v27  ;;  %v402_v22 = vrot.slane %v388_v16, %v3759_v31 }
  0xb6   :  { %2296 = vrot.lane.b32.xlu1 %v224_v62, %s3697_s17  ;;  %v387_v62 = vcombine.low %v364_v50, %v379_v47 }
  0xb7   :  { %v3808_v0 = vpop.trf.xlu1  ;;  %v3810_v1 = vpop.trf.xlu0  ;;  %v386_v15 = vrot.slane %v372_v56, %v3745_v17  ;;  %v420_v34 = vcombine.high %v402_v22, %v3691_v27 }
  0xb9   :  { %2300 = vrot.lane.b32.xlu0 %v263_v63, %s3698_s18  ;;  %v355_v63 = vcombine.high %v345_v54, %v3691_v27  ;;  %v403_v23 = vcombine.low %v371_v5, %v386_v15 }
  0xba   :  { %2304 = vrot.lane.b32.xlu1 %v287_v2, %s3699_s19  ;;  %v352_v2 = vrot.slane %v338_v55, %v3759_v31 }
  0xbb   :  { %v3818_v6 = vpop.trf.xlu1  ;;  %v3820_v7 = vpop.trf.xlu0  ;;  %v411_v12 = vrot.slane %v403_v23, %v3759_v31 }
  0xbc   :  { %v356_v8 = vcombine.high %v352_v2, %v3691_v27 }
  0xbd   :  { %2308 = vrot.lane.b32.xlu0 %v270_v3, %s3700_s20  ;;  %v421_v50 = vcombine.high %v411_v12, %v3691_v27 }
  0xbe   :  { %2312 = vrot.lane.b32.xlu1 %v288_v9, %s3701_s21  ;;  %v395_v9 = vrot.slane %v387_v62, %v3759_v31 }
  0xbf   :  { %v3830_v18 = vpop.trf.xlu1  ;;  %v3832_v19 = vpop.trf.xlu0 }
  0xc0   :  { %v419_v14 = vcombine.high %v395_v9, %v3691_v27 }
  0xc1   :  { %2316 = vrot.lane.b32.xlu0 %v279_v10, %s3702_s22 }
  0xc2   :  { %2320 = vrot.lane.b32.xlu1 %v289_v24, %s3703_s23  ;;  %v445_v24 = vrot.slane %v3747_v20, %v3745_v17 }
  0xc3   :  { %v3841_v29 = vpop.trf.xlu1  ;;  %v3843_v30 = vpop.trf.xlu0 }
  0xc5   :  { %2324 = vrot.lane.b32.xlu0 %v286_v28, %s5311_s24  ;;  %v430_v28 = vrot.slane %v3749_v21, %v3745_v17 }
  0xc6   :  { %2328 = vrot.lane.b32.xlu1 %v290_v35, %s5303_s25  ;;  %v404_v35 = vcombine.high %v371_v5, %v386_v15 }
  0xc7   :  { %v3850_v37 = vpop.trf.xlu1  ;;  %v3852_v40 = vpop.trf.xlu0  ;;  %v453_v46 = vcombine.low %v430_v28, %v445_v24  ;;  %v454_v55 = vcombine.high %v430_v28, %v445_v24  ;;  %v504_v28 = vcombine.high %v3753_v25, %v3691_v27 }
  0xc9   :  { %2332 = vrot.lane.b32.xlu0 %v329_v36, %s3706_s26  ;;  %v468_v15 = vrot.slane %v454_v55, %v3759_v31 }
  0xca   :  { %2336 = vrot.lane.b32.xlu1 %v353_v41, %s3707_s27  ;;  %v438_v41 = vcombine.high %v3747_v20, %v3691_v27 }
  0xcb   :  { %v3860_v48 = vpop.trf.xlu1  ;;  %v3862_v49 = vpop.trf.xlu0 }
  0xcd   :  { %2340 = vrot.lane.b32.xlu0 %v336_v45, %s5300_s28  ;;  %v423_v45 = vcombine.high %v3749_v21, %v3691_v27  ;;  %v3925_v21 = vrot.slane %v453_v46, %v3759_v31 }
  0xce   :  { %2344 = vrot.lane.b32.xlu1 %v354_v53, %s3709_s29  ;;  %v418_v53 = vrot.slane %v404_v35, %v3759_v31 }
  0xcf   :  { %v3872_v57 = vpop.trf.xlu1  ;;  %v3874_v60 = vpop.trf.xlu0  ;;  %v437_v20 = vrot.slane %v423_v45, %v3745_v17 }
  0xd0   :  { %v422_v62 = vcombine.high %v418_v53, %v3691_v27 }
  0xd1   :  { %2348 = vrot.lane.b32.xlu0 %v345_v54, %s3710_s30  ;;  %v452_v54 = vrot.slane %v438_v41, %v3745_v17 }
  0xd2   :  { %2352 = vrot.lane.b32.xlu1 %v355_v63, %s5296_s2 }
  0xd3   :  { %v3883_v3 = vpop.trf.xlu1  ;;  %v3885_v4 = vpop.trf.xlu0  ;;  %v469_v63 = vcombine.low %v437_v20, %v452_v54 }
  0xd5   :  { %2356 = vrot.lane.b32.xlu0 %v352_v2, %s3712_s3  ;;  %v485_v2 = vcombine.high %v3925_v21, %v3691_v27  ;;  %v477_v23 = vrot.slane %v469_v63, %v3759_v31 }
  0xd6   :  { %2360 = vrot.lane.b32.xlu1 %v356_v8, %s3713_s4  ;;  %v470_v8 = vcombine.high %v437_v20, %v452_v54 }
  0xd7   :  { %v3892_v10 = vpop.trf.xlu1  ;;  %v3894_v13 = vpop.trf.xlu0  ;;  %v487_v35 = vcombine.high %v477_v23, %v3691_v27 }
  0xd8   :  { %v484_v41 = vrot.slane %v470_v8, %v3759_v31 }
  0xd9   :  { %2364 = vrot.lane.b32.xlu0 %v395_v9, %s5279_s5  ;;  %v511_v9 = vrot.slane %v3753_v25, %v3745_v17 }
  0xda   :  { %2368 = vrot.lane.b32.xlu1 %v419_v14, %s3715_s6  ;;  %v496_v14 = vrot.slane %v3755_v26, %v3745_v17 }
  0xdb   :  { %v3904_v11 = vpop.trf.xlu1  ;;  %v3909_v36 = vpop.trf.xlu0 }
  0xdd   :  { %2372 = vrot.lane.b32.xlu0 %v402_v22, %s3716_s7  ;;  %v486_v22 = vcombine.high %v468_v15, %v3691_v27 }
  0xde   :  { %2376 = vrot.lane.b32.xlu1 %v420_v34, %s3717_s8  ;;  %v489_v34 = vcombine.high %v3755_v26, %v3691_v27  ;;  %v488_v26 = vcombine.high %v484_v41, %v3691_v27 }
  0xdf   :  { %v3916_v47 = vpop.trf.xlu1  ;;  %v3927_v56 = vpop.trf.xlu0 }
  0xe0   :  { %v503_v25 = vrot.slane %v489_v34, %v3745_v17  ;;  %v570_v34 = vcombine.high %v3761_v32, %v3691_v27 }
  0xe1   :  { %2380 = vrot.lane.b32.xlu0 %v411_v12, %s5274_s9  ;;  %s5325_s9 = smov 124   ;;  %v519_v12 = vcombine.low %v496_v14, %v511_v9 }
  0xe2   :  { %2384 = vrot.lane.b32.xlu1 %v421_v50, %s3719_s11  ;;  %v518_v50 = vrot.slane %v504_v28, %v3745_v17 }
  0xe3   :  { %v3929_v61 = vpop.trf.xlu1  ;;  %v3940_v16 = vpop.trf.xlu0  ;;  %v527_v54 = vrot.slane %v519_v12, %v3759_v31  ;;  %v555_v12 = vcombine.high %v3763_v33, %v3691_v27 }
  0xe4   :  { %5331 = vst [vmem:[#allocation8_spill] sm:$0xff] %v3929_v61  ;;  %5333 = vst [vmem:[#allocation10_spill] sm:$0xff] %v3940_v16 }
  0xe5   :  { %2388 = vrot.lane.b32.xlu0 %v418_v53, %s3720_s12  ;;  %v520_v53 = vcombine.high %v496_v14, %v511_v9  ;;  %v551_v63 = vcombine.high %v527_v54, %v3691_v27  ;;  %v536_v9 = vcombine.high %v503_v25, %v518_v50  ;;  %v562_v14 = vrot.slane %v3763_v33, %v3745_v17 }
  0xe6   :  { %2392 = vrot.lane.b32.xlu1 %v422_v62, %s5325_s9  ;;  %v535_v62 = vcombine.low %v503_v25, %v518_v50 }
  0xe7   :  { %v3937_v5 = vpop.trf.xlu1  ;;  %v3959_v45 = vpop.trf.xlu0  ;;  %v550_v50 = vrot.slane %v536_v9, %v3759_v31 }
  0xe8   :  { %5332 = vst [vmem:[#allocation9_spill] sm:$0xff] %v3937_v5  ;;  %5335 = vst [vmem:[#allocation12_spill] sm:$0xff] %v3959_v45 }
  0xe9   :  { %2396 = vrot.lane.b32.xlu0 %v485_v2, %s3694_s14  ;;  %v534_v2 = vrot.slane %v520_v53, %v3759_v31  ;;  %v554_v33 = vcombine.high %v550_v50, %v3691_v27 }
  0xea   :  { %2400 = vrot.lane.b32.xlu1 %v468_v15, %s3688_s10  ;;  %v577_v15 = vrot.slane %v3761_v32, %v3745_v17  ;;  %v569_v32 = vrot.slane %v555_v12, %v3745_v17 }
  0xeb   :  { %v3949_v24 = vpop.trf.xlu1  ;;  %v3972_v55 = vpop.trf.xlu0 }
  0xec   :  { %5334 = vst [vmem:[#allocation11_spill] sm:$0xff] %v3949_v24  ;;  %5338 = vst [vmem:[#allocation15_spill] sm:$0xff] %v3972_v55 }
  0xed   :  { %2404 = vrot.lane.b32.xlu0 %v486_v22, %s3692_s0  ;;  %v552_v22 = vcombine.high %v534_v2, %v3691_v27 }
  0xee   :  { %2408 = vrot.lane.b32.xlu1 %v477_v23, %s3693_s13  ;;  %v543_v23 = vrot.slane %v535_v62, %v3759_v31 }
  0xef   :  { %v3961_v46 = vpop.trf.xlu1  ;;  %v3987_v28 = vpop.trf.xlu0 }
  0xf0   :  { %5336 = vst [vmem:[#allocation13_spill] sm:$0xff] %v3961_v46  ;;  %5340 = vst [vmem:[#allocation17_spill] sm:$0xff] %v3987_v28 }
  0xf1   :  { %2412 = vrot.lane.b32.xlu0 %v487_v35, %s3695_s15  ;;  %v585_v35 = vcombine.low %v562_v14, %v577_v15 }
  0xf2   :  { %2416 = vrot.lane.b32.xlu1 %v484_v41, %s3696_s16  ;;  %v553_v41 = vcombine.high %v543_v23, %v3691_v27 }
  0xf3   :  { %v3969_v20 = vpop.trf.xlu1  ;;  %v4000_v53 = vpop.trf.xlu0  ;;  %v593_v62 = vrot.slane %v585_v35, %v3759_v31 }
  0xf4   :  { %5337 = vst [vmem:[#allocation14_spill] sm:$0xff] %v3969_v20  ;;  %5342 = vst [vmem:[#allocation19_spill] sm:$0xff] %v4000_v53 }
  0xf5   :  { %2420 = vrot.lane.b32.xlu0 %v488_v26, %s3697_s17  ;;  %v584_v26 = vrot.slane %v570_v34, %v3745_v17  ;;  %v628_v34 = vrot.slane %v3771_v39, %v3745_v17 }
  0xf6   :  { %2424 = vrot.lane.b32.xlu1 %v527_v54, %s3698_s18  ;;  %v586_v54 = vcombine.high %v562_v14, %v577_v15  ;;  %v643_v14 = vrot.slane %v3769_v38, %v3745_v17 }
  0xf7   :  { %v3981_v8 = vpop.trf.xlu1  ;;  %v4011_v9 = vpop.trf.xlu0  ;;  %v602_v15 = vcombine.high %v569_v32, %v584_v26 }
  0xf8   :  { %5339 = vst [vmem:[#allocation16_spill] sm:$0xff] %v3981_v8  ;;  %5344 = vst [vmem:[#allocation21_spill] sm:$0xff] %v4011_v9 }
  0xf9   :  { %2428 = vrot.lane.b32.xlu0 %v551_v63, %s3699_s19 }
  0xfa   :  { %2432 = vrot.lane.b32.xlu1 %v534_v2, %s3700_s20  ;;  %v601_v2 = vcombine.low %v569_v32, %v584_v26  ;;  %v636_v26 = vcombine.high %v3769_v38, %v3691_v27  ;;  %v621_v32 = vcombine.high %v3771_v39, %v3691_v27 }
  0xfb   :  { %v3997_v25 = vpop.trf.xlu1 }
  0xfc   :  { %5341 = vst [vmem:[#allocation18_spill] sm:$0xff] %v3997_v25  ;;  %v609_v35 = vrot.slane %v601_v2, %v3759_v31  ;;  %v650_v2 = vrot.slane %v636_v26, %v3745_v17  ;;  %v635_v38 = vrot.slane %v621_v32, %v3745_v17 }
  0xfd   :  { %2436 = vrot.lane.b32.xlu0 %v552_v22, %s3701_s21  ;;  %v617_v22 = vcombine.high %v593_v62, %v3691_v27 }
  0xfe   :  { %2440 = vrot.lane.b32.xlu1 %v543_v23, %s3702_s22  ;;  %v600_v23 = vrot.slane %v586_v54, %v3759_v31  ;;  %v651_v54 = vcombine.low %v628_v34, %v643_v14 }
  0xff   :  { %v4009_v63 = vpop.trf.xlu1 }
 0x100   :  { %5343 = vst [vmem:[#allocation20_spill] sm:$0xff] %v4009_v63  ;;  %v618_v12 = vcombine.high %v600_v23, %v3691_v27  ;;  %v659_v9 = vrot.slane %v651_v54, %v3759_v31  ;;  %v668_v54 = vcombine.high %v635_v38, %v650_v2 }
 0x101   :  { %2444 = vrot.lane.b32.xlu0 %v553_v41, %s3703_s23 }
 0x102   :  { %2448 = vrot.lane.b32.xlu1 %v550_v50, %s5311_s24  ;;  %v4025_v50 = vpop.trf.xlu0 }
 0x103   :  { %v4023_v41 = vpop.trf.xlu1  ;;  %5346 = vst [vmem:[#allocation23_spill] sm:$0xff] %v4025_v50 }
 0x104   :  { %5345 = vst [vmem:[#allocation22_spill] sm:$0xff] %v4023_v41 }
 0x105   :  { %2452 = vrot.lane.b32.xlu0 %v554_v33, %s5303_s25  ;;  %v619_v33 = vcombine.high %v609_v35, %v3691_v27 }
 0x106   :  { %2456 = vrot.lane.b32.xlu1 %v593_v62, %s3706_s26  ;;  %v616_v62 = vrot.slane %v602_v15, %v3759_v31  ;;  %v667_v15 = vcombine.low %v635_v38, %v650_v2  ;;  %v682_v38 = vrot.slane %v668_v54, %v3759_v31 }
 0x108   :  { %v620_v39 = vcombine.high %v616_v62, %v3691_v27 }
 0x109   :  { %2460 = vrot.lane.b32.xlu0 %v617_v22, %s3707_s27  ;;  %v4038_v22 = vpop.trf.xlu1 }
 0x10a   :  { %2464 = vrot.lane.b32.xlu1 %v600_v23, %s5300_s28  ;;  %5347 = vst [vmem:[#allocation24_spill] sm:$0xff] %v4038_v22  ;;  %v652_v23 = vcombine.high %v628_v34, %v643_v14  ;;  %v694_v14 = vrot.slane %v3780_v44, %v3745_v17 }
 0x10c   :  { %v666_v26 = vrot.slane %v652_v23, %v3759_v31  ;;  %v702_v23 = vcombine.high %v3778_v43, %v3691_v27 }
 0x10d   :  { %2468 = vrot.lane.b32.xlu0 %v618_v12, %s3709_s29  ;;  %v4041_v12 = vpop.trf.xlu0 }
 0x10e   :  { %2472 = vrot.lane.b32.xlu1 %v609_v35, %s3710_s30  ;;  %5348 = vst [vmem:[#allocation25_spill] sm:$0xff] %v4041_v12  ;;  %v683_v35 = vcombine.high %v659_v9, %v3691_v27 }
 0x111   :  { %2476 = vrot.lane.b32.xlu0 %v619_v33, %s5296_s2  ;;  %v709_v33 = vrot.slane %v3778_v43, %v3745_v17  ;;  %v4055_v32 = vpop.trf.xlu0 }
 0x112   :  { %2480 = vrot.lane.b32.xlu1 %v616_v62, %s3712_s3  ;;  %5349 = vst [vmem:[#allocation26_spill] sm:$0xff] %v4055_v32  ;;  %v684_v62 = vcombine.high %v666_v26, %v3691_v27 }
 0x113   :  { %v717_v22 = vcombine.low %v694_v14, %v709_v33 }
 0x115   :  { %2484 = vrot.lane.b32.xlu0 %v620_v39, %s3713_s4  ;;  %v687_v39 = vcombine.high %v3780_v44, %v3691_v27  ;;  %v4076_v44 = vrot.slane %v717_v22, %v3759_v31 }
 0x116   :  { %2488 = vrot.lane.b32.xlu1 %v659_v9, %s5279_s5  ;;  %v675_v9 = vrot.slane %v667_v15, %v3759_v31  ;;  %s5350_s5 = smov 112   ;;  %v716_v15 = vrot.slane %v702_v23, %v3745_v17 }
 0x117   :  { %v701_v43 = vrot.slane %v687_v39, %v3745_v17  ;;  %v749_v23 = vcombine.high %v4076_v44, %v3691_v27  ;;  %v775_v39 = vrot.slane %v3789_v51, %v3745_v17 }
 0x118   :  { %v4053_v34 = vpop.permute.xlu1 %2276  ;;  %v685_v2 = vcombine.high %v675_v9, %v3691_v27 }
 0x119   :  { %2492 = vrot.lane.b32.xlu0 %v683_v35, %s3715_s6  ;;  %v4069_v35 = vpop.trf.xlu0  ;;  %v734_v22 = vcombine.high %v701_v43, %v716_v15 }
 0x11a   :  { %2496 = vrot.lane.b32.xlu1 %v666_v26, %s3716_s7  ;;  %5351 = vst [vmem:[#allocation27_spill] sm:$0xff] %v4069_v35  ;;  %v718_v26 = vcombine.high %v694_v14, %v709_v33  ;;  %v733_v35 = vcombine.low %v701_v43, %v716_v15  ;;  %v768_v15 = vcombine.high %v3789_v51, %v3691_v27 }
 0x11b   :  { %v748_v12 = vrot.slane %v734_v22, %v3759_v31 }
 0x11c   :  { %v4065_v8 = vpop.permute.xlu1 %2280  ;;  %v732_v33 = vrot.slane %v718_v26, %v3759_v31  ;;  %v741_v53 = vrot.slane %v733_v35, %v3759_v31  ;;  %v753_v26 = vcombine.high %v3791_v52, %v3691_v27 }
 0x11d   :  { %2500 = vrot.lane.b32.xlu0 %v684_v62, %s3717_s8 }
 0x11e   :  { %2504 = vrot.lane.b32.xlu1 %v675_v9, %s5350_s5  ;;  %v686_v9 = vcombine.high %v682_v38, %v3691_v27  ;;  %v750_v41 = vcombine.high %v732_v33, %v3691_v27  ;;  %v751_v20 = vcombine.high %v741_v53, %v3691_v27  ;;  %v767_v51 = vrot.slane %v753_v26, %v3745_v17 }
 0x120   :  { %v4078_v32 = vpop.permute.xlu1 %2284 }
 0x121   :  { %2508 = vrot.lane.b32.xlu0 %v685_v2, %s3719_s11  ;;  %v760_v2 = vrot.slane %v3791_v52, %v3745_v17  ;;  %v752_v52 = vcombine.high %v748_v12, %v3691_v27 }
 0x122   :  { %2512 = vrot.lane.b32.xlu1 %v682_v38, %s3720_s12 }
 0x123   :  { %v4082_v62 = vpop.permute.xlu0 %2272 }
 0x124   :  { %v4085_v54 = vpop.permute.xlu1 %2288 }
 0x125   :  { %2516 = vrot.lane.b32.xlu0 %v686_v9, %s5325_s9  ;;  %v783_v9 = vcombine.low %v760_v2, %v775_v39 }
 0x126   :  { %2520 = vrot.lane.b32.xlu1 %v749_v23, %s3694_s14 }
 0x127   :  { %v4092_v14 = vpop.permute.xlu0 %2292  ;;  %v791_v50 = vrot.slane %v783_v9, %v3759_v31  ;;  %v826_v9 = vrot.slane %v3801_v59, %v3745_v17 }
 0x128   :  { %v4098_v38 = vpop.permute.xlu1 %2296 }
 0x129   :  { %2524 = vrot.lane.b32.xlu0 %v732_v33, %s3688_s10  ;;  %v784_v33 = vcombine.high %v760_v2, %v775_v39  ;;  %v841_v39 = vrot.slane %v3799_v58, %v3745_v17 }
 0x12a   :  { %2528 = vrot.lane.b32.xlu1 %v750_v41, %s3692_s0  ;;  %v782_v41 = vrot.slane %v768_v15, %v3745_v17  ;;  %v815_v15 = vcombine.high %v791_v50, %v3691_v27 }
 0x12b   :  { %v4106_v43 = vpop.permute.xlu0 %2300  ;;  %v798_v26 = vrot.slane %v784_v33, %v3759_v31 }
 0x12c   :  { %v4110_v23 = vpop.permute.xlu1 %2304 }
 0x12d   :  { %2532 = vrot.lane.b32.xlu0 %v741_v53, %s3693_s13  ;;  %v816_v25 = vcombine.high %v798_v26, %v3691_v27 }
 0x12e   :  { %2536 = vrot.lane.b32.xlu1 %v751_v20, %s3695_s15  ;;  %v799_v20 = vcombine.low %v767_v51, %v782_v41 }
 0x12f   :  { %v4117_v35 = vpop.permute.xlu0 %2308 }
 0x130   :  { %v4120_v63 = vpop.permute.xlu1 %2312  ;;  %v807_v28 = vrot.slane %v799_v20, %v3759_v31 }
 0x131   :  { %2540 = vrot.lane.b32.xlu0 %v748_v12, %s3696_s16  ;;  %v800_v12 = vcombine.high %v767_v51, %v782_v41  ;;  %v819_v41 = vcombine.high %v3801_v59, %v3691_v27  ;;  %v849_v51 = vcombine.low %v826_v9, %v841_v39 }
 0x132   :  { %2544 = vrot.lane.b32.xlu1 %v752_v52, %s3697_s17  ;;  %v817_v46 = vcombine.high %v807_v28, %v3691_v27 }
 0x133   :  { %v4126_v53 = vpop.permute.xlu0 %2316  ;;  %v814_v55 = vrot.slane %v800_v12, %v3759_v31  ;;  %v857_v45 = vrot.slane %v849_v51, %v3759_v31  ;;  %v892_v51 = vrot.slane %v3810_v1, %v3745_v17 }
 0x134   :  { %v4128_v22 = vpop.permute.xlu1 %2320 }
 0x135   :  { %5352 = vst [vmem:[#allocation28_spill] sm:$0xff] %v4128_v22  ;;  %2548 = vrot.lane.b32.xlu0 %v791_v50, %s3698_s18  ;;  %v834_v50 = vcombine.high %v3799_v58, %v3691_v27  ;;  %v833_v58 = vrot.slane %v819_v41, %v3745_v17  ;;  %v818_v59 = vcombine.high %v814_v55, %v3691_v27 }
 0x136   :  { %2552 = vrot.lane.b32.xlu1 %v815_v15, %s3699_s19 }
 0x137   :  { %v4136_v2 = vpop.permute.xlu0 %2324 }
 0x138   :  { %5353 = vst [vmem:[#allocation29_spill] sm:$0xff] %v4136_v2  ;;  %v4140_v52 = vpop.permute.xlu1 %2328 }
 0x139   :  { %5354 = vst [vmem:[#allocation30_spill] sm:$0xff] %v4140_v52  ;;  %2556 = vrot.lane.b32.xlu0 %v798_v26, %s3700_s20  ;;  %v850_v26 = vcombine.high %v826_v9, %v841_v39 }
 0x13a   :  { %2560 = vrot.lane.b32.xlu1 %v816_v25, %s3701_s21  ;;  %v848_v25 = vrot.slane %v834_v50, %v3745_v17  ;;  %v881_v50 = vcombine.high %v857_v45, %v3691_v27 }
 0x13b   :  { %v4148_v33 = vpop.permute.xlu0 %2332  ;;  %v864_v41 = vrot.slane %v850_v26, %v3759_v31 }
 0x13c   :  { %5355 = vst [vmem:[#allocation31_spill] sm:$0xff] %v4148_v33  ;;  %v4152_v15 = vpop.permute.xlu1 %2336  ;;  %v866_v39 = vcombine.high %v833_v58, %v848_v25 }
 0x13d   :  { %5356 = vst [vmem:[#allocation32_spill] sm:$0xff] %v4152_v15  ;;  %2564 = vrot.lane.b32.xlu0 %v807_v28, %s3702_s22  ;;  %v882_v5 = vcombine.high %v864_v41, %v3691_v27 }
 0x13e   :  { %2568 = vrot.lane.b32.xlu1 %v817_v46, %s3703_s23  ;;  %v865_v46 = vcombine.low %v833_v58, %v848_v25  ;;  %v885_v58 = vcombine.high %v3810_v1, %v3691_v27 }
 0x13f   :  { %v4159_v20 = vpop.permute.xlu0 %2340 }
 0x140   :  { %5357 = vst [vmem:[#allocation33_spill] sm:$0xff] %v4159_v20  ;;  %v4162_v24 = vpop.permute.xlu1 %2344 }
 0x141   :  { %5358 = vst [vmem:[#allocation34_spill] sm:$0xff] %v4162_v24  ;;  %2572 = vrot.lane.b32.xlu0 %v814_v55, %s5311_s24  ;;  %v907_v55 = vrot.slane %v3808_v0, %v3745_v17 }
 0x142   :  { %2576 = vrot.lane.b32.xlu1 %v818_v59, %s5303_s25 }
 0x143   :  { %v4168_v28 = vpop.permute.xlu0 %2348  ;;  %v915_v26 = vcombine.low %v892_v51, %v907_v55 }
 0x144   :  { %5359 = vst [vmem:[#allocation35_spill] sm:$0xff] %v4168_v28  ;;  %v4170_v12 = vpop.permute.xlu1 %2352 }
 0x145   :  { %5360 = vst [vmem:[#allocation36_spill] sm:$0xff] %v4170_v12  ;;  %2580 = vrot.lane.b32.xlu0 %v857_v45, %s3706_s26  ;;  %v873_v12 = vrot.slane %v865_v46, %v3759_v31  ;;  %v900_v45 = vcombine.high %v3808_v0, %v3691_v27  ;;  %v899_v0 = vrot.slane %v885_v58, %v3745_v17 }
 0x146   :  { %2584 = vrot.lane.b32.xlu1 %v881_v50, %s3707_s27 }
 0x147   :  { %v4176_v9 = vpop.permute.xlu0 %2356 }
 0x148   :  { %5361 = vst [vmem:[#allocation37_spill] sm:$0xff] %v4176_v9  ;;  %v4182_v59 = vpop.permute.xlu1 %2360  ;;  %v880_v9 = vrot.slane %v866_v39, %v3759_v31 }
 0x149   :  { %5362 = vst [vmem:[#allocation38_spill] sm:$0xff] %v4182_v59  ;;  %2588 = vrot.lane.b32.xlu0 %v864_v41, %s5300_s28  ;;  %v883_v59 = vcombine.high %v873_v12, %v3691_v27  ;;  %v916_v41 = vcombine.high %v892_v51, %v907_v55  ;;  %v973_v55 = vrot.slane %v3818_v6, %v3745_v17 }
 0x14a   :  { %2592 = vrot.lane.b32.xlu1 %v882_v5, %s3709_s29  ;;  %v914_v5 = vrot.slane %v900_v45, %v3745_v17  ;;  %v884_v1 = vcombine.high %v880_v9, %v3691_v27 }
 0x14b   :  { %v4190_v25 = vpop.permute.xlu0 %2364  ;;  %v930_v58 = vrot.slane %v916_v41, %v3759_v31  ;;  %v951_v41 = vcombine.high %v3820_v7, %v3691_v27 }
 0x14c   :  { %5363 = vst [vmem:[#allocation39_spill] sm:$0xff] %v4190_v25  ;;  %v4194_v50 = vpop.permute.xlu1 %2368  ;;  %v931_v39 = vcombine.low %v899_v0, %v914_v5 }
 0x14d   :  { %5364 = vst [vmem:[#allocation40_spill] sm:$0xff] %v4194_v50  ;;  %2596 = vrot.lane.b32.xlu0 %v873_v12, %s3710_s30  ;;  %v923_v50 = vrot.slane %v915_v26, %v3759_v31  ;;  %v932_v26 = vcombine.high %v899_v0, %v914_v5 }
 0x14e   :  { %2600 = vrot.lane.b32.xlu1 %v883_v59, %s5296_s2  ;;  %s5369_s2 = smov 96  }
 0x14f   :  { %v4201_v46 = vpop.permute.xlu0 %2372  ;;  %v947_v45 = vcombine.high %v923_v50, %v3691_v27 }
 0x150   :  { %5365 = vst [vmem:[#allocation41_spill] sm:$0xff] %v4201_v46  ;;  %v4204_v25 = vpop.permute.xlu1 %2376 }
 0x151   :  { %5366 = vst [vmem:[#allocation42_spill] sm:$0xff] %v4204_v25  ;;  %2604 = vrot.lane.b32.xlu0 %v880_v9, %s3712_s3  ;;  %v958_v9 = vrot.slane %v3820_v7, %v3745_v17 }
 0x152   :  { %2608 = vrot.lane.b32.xlu1 %v884_v1, %s3713_s4 }
 0x153   :  { %v4210_v12 = vpop.permute.xlu0 %2380 }
 0x154   :  { %5367 = vst [vmem:[#allocation43_spill] sm:$0xff] %v4210_v12  ;;  %v4212_v59 = vpop.permute.xlu1 %2384  ;;  %v939_v12 = vrot.slane %v931_v39, %v3759_v31 }
 0x155   :  { %5368 = vst [vmem:[#allocation44_spill] sm:$0xff] %v4212_v59  ;;  %2612 = vrot.lane.b32.xlu0 %v923_v50, %s5369_s2  ;;  %v948_v59 = vcombine.high %v930_v58, %v3691_v27  ;;  %v966_v50 = vcombine.high %v3818_v6, %v3691_v27  ;;  %v965_v6 = vrot.slane %v951_v41, %v3745_v17 }
 0x156   :  { %2616 = vrot.lane.b32.xlu1 %v947_v45, %s3715_s6  ;;  %v981_v45 = vcombine.low %v958_v9, %v973_v55  ;;  %v949_v0 = vcombine.high %v939_v12, %v3691_v27 }
 0x157   :  { %v4222_v51 = vpop.permute.xlu0 %2388  ;;  %v980_v39 = vrot.slane %v966_v50, %v3745_v17 }
 0x158   :  { %5370 = vst [vmem:[#allocation45_spill] sm:$0xff] %v4222_v51  ;;  %v4224_v1 = vpop.permute.xlu1 %2392  ;;  %v4245_v7 = vrot.slane %v981_v45, %v3759_v31 }
 0x159   :  { %5371 = vst [vmem:[#allocation46_spill] sm:$0xff] %v4224_v1  ;;  %2620 = vrot.lane.b32.xlu0 %v930_v58, %s3716_s7  ;;  %v946_v1 = vrot.slane %v932_v26, %v3759_v31  ;;  %v998_v41 = vcombine.high %v965_v6, %v980_v39 }
 0x15a   :  { %2624 = vrot.lane.b32.xlu1 %v948_v59, %s3717_s8  ;;  %v982_v59 = vcombine.high %v958_v9, %v973_v55  ;;  %v1013_v50 = vcombine.high %v4245_v7, %v3691_v27 }
 0x15b   :  { %v4234_v25 = vpop.permute.xlu0 %2396  ;;  %v950_v46 = vcombine.high %v946_v1, %v3691_v27  ;;  %v1012_v20 = vrot.slane %v998_v41, %v3759_v31 }
 0x15c   :  { %v4236_v5 = vpop.permute.xlu1 %2400  ;;  %v996_v55 = vrot.slane %v982_v59, %v3759_v31 }
 0x15d   :  { %2628 = vrot.lane.b32.xlu0 %v939_v12, %s5350_s5  ;;  %v997_v12 = vcombine.low %v965_v6, %v980_v39  ;;  %v1032_v39 = vcombine.high %v3830_v18, %v3691_v27  ;;  %v1017_v6 = vcombine.high %v3832_v19, %v3691_v27 }
 0x15e   :  { %2632 = vrot.lane.b32.xlu1 %v949_v0, %s3719_s11  ;;  %v1014_v45 = vcombine.high %v996_v55, %v3691_v27 }
 0x15f   :  { %v4247_v58 = vpop.permute.xlu0 %2404  ;;  %v1005_v28 = vrot.slane %v997_v12, %v3759_v31 }
 0x160   :  { %v4249_v51 = vpop.permute.xlu1 %2408 }
 0x161   :  { %2636 = vrot.lane.b32.xlu0 %v946_v1, %s3720_s12  ;;  %v1039_v1 = vrot.slane %v3830_v18, %v3745_v17  ;;  %v1031_v18 = vrot.slane %v1017_v6, %v3745_v17 }
 0x162   :  { %2640 = vrot.lane.b32.xlu1 %v950_v46, %s5325_s9  ;;  %v1024_v46 = vrot.slane %v3832_v19, %v3745_v17  ;;  %v1016_v19 = vcombine.high %v1012_v20, %v3691_v27 }
 0x163   :  { %v4254_v26 = vpop.permute.xlu0 %2412 }
 0x164   :  { %v4259_v9 = vpop.permute.xlu1 %2416  ;;  %v1048_v15 = vcombine.high %v1024_v46, %v1039_v1 }
 0x165   :  { %2644 = vrot.lane.b32.xlu0 %v1013_v50, %s3694_s14  ;;  %v1047_v50 = vcombine.low %v1024_v46, %v1039_v1 }
 0x166   :  { %2648 = vrot.lane.b32.xlu1 %v996_v55, %s3688_s10  ;;  %v1015_v55 = vcombine.high %v1005_v28, %v3691_v27  ;;  %v1062_v6 = vrot.slane %v1048_v15, %v3759_v31 }
 0x167   :  { %v4268_v0 = vpop.permute.xlu0 %2420  ;;  %v1055_v52 = vrot.slane %v1047_v50, %v3759_v31  ;;  %v1090_v50 = vrot.slane %v3843_v30, %v3745_v17 }
 0x168   :  { %v4271_v59 = vpop.permute.xlu1 %2424  ;;  %v1080_v16 = vcombine.high %v1062_v6, %v3691_v27 }
 0x169   :  { %2652 = vrot.lane.b32.xlu0 %v1014_v45, %s3692_s0  ;;  %v1046_v45 = vrot.slane %v1032_v39, %v3745_v17  ;;  %v1079_v39 = vcombine.high %v1055_v52, %v3691_v27 }
 0x16a   :  { %2656 = vrot.lane.b32.xlu1 %v1005_v28, %s3693_s13 }
 0x16b   :  { %v4279_v24 = vpop.permute.xlu0 %2428  ;;  %v1063_v41 = vcombine.low %v1031_v18, %v1046_v45  ;;  %v1064_v46 = vcombine.high %v1031_v18, %v1046_v45  ;;  %v1083_v45 = vcombine.high %v3843_v30, %v3691_v27 }
 0x16c   :  { %v4283_v12 = vpop.permute.xlu1 %2432 }
 0x16d   :  { %2660 = vrot.lane.b32.xlu0 %v1015_v55, %s3695_s15 }
 0x16e   :  { %2664 = vrot.lane.b32.xlu1 %v1012_v20, %s3696_s16  ;;  %v1105_v20 = vrot.slane %v3841_v29, %v3745_v17 }
 0x16f   :  { %v4289_v33 = vpop.permute.xlu0 %2436 }
 0x170   :  { %v4293_v28 = vpop.permute.xlu1 %2440  ;;  %v1113_v18 = vcombine.low %v1090_v50, %v1105_v20 }
 0x171   :  { %2668 = vrot.lane.b32.xlu0 %v1016_v19, %s3697_s17 }
 0x172   :  { %2672 = vrot.lane.b32.xlu1 %v1055_v52, %s3698_s18  ;;  %v1071_v52 = vrot.slane %v1063_v41, %v3759_v31 }
 0x173   :  { %v4297_v55 = vpop.permute.xlu0 %2444 }
 0x174   :  { %5372 = vst [vmem:[#allocation47_spill] sm:$0xff] %v4297_v55  ;;  %v4301_v1 = vpop.permute.xlu1 %2448 }
 0x175   :  { %5373 = vst [vmem:[#allocation48_spill] sm:$0xff] %v4301_v1  ;;  %2676 = vrot.lane.b32.xlu0 %v1079_v39, %s3699_s19  ;;  %v1098_v39 = vcombine.high %v3841_v29, %v3691_v27  ;;  %v1097_v29 = vrot.slane %v1083_v45, %v3745_v17 }
 0x176   :  { %2680 = vrot.lane.b32.xlu1 %v1062_v6, %s3700_s20  ;;  %v1078_v6 = vrot.slane %v1064_v46, %v3759_v31 }
 0x177   :  { %v4309_v19 = vpop.permute.xlu0 %2452 }
 0x178   :  { %5374 = vst [vmem:[#allocation49_spill] sm:$0xff] %v4309_v19  ;;  %v4313_v15 = vpop.permute.xlu1 %2456  ;;  %v1081_v19 = vcombine.high %v1071_v52, %v3691_v27  ;;  %v1082_v30 = vcombine.high %v1078_v6, %v3691_v27 }
 0x179   :  { %5375 = vst [vmem:[#allocation50_spill] sm:$0xff] %v4313_v15  ;;  %2684 = vrot.lane.b32.xlu0 %v1080_v16, %s3701_s21  ;;  %v1112_v16 = vrot.slane %v1098_v39, %v3745_v17  ;;  %v1114_v15 = vcombine.high %v1090_v50, %v1105_v20 }
 0x17a   :  { %2688 = vrot.lane.b32.xlu1 %v1071_v52, %s3702_s22 }
 0x17b   :  { %v4321_v61 = vpop.permute.xlu0 %2460  ;;  %v1129_v46 = vcombine.low %v1097_v29, %v1112_v16  ;;  %v1128_v45 = vrot.slane %v1114_v15, %v3759_v31  ;;  %v1130_v50 = vcombine.high %v1097_v29, %v1112_v16  ;;  %v1164_v16 = vcombine.high %v3850_v37, %v3691_v27 }
 0x17c   :  { %5376 = vst [vmem:[#allocation51_spill] sm:$0xff] %v4321_v61  ;;  %v4325_v41 = vpop.permute.xlu1 %2464  ;;  %v1121_v61 = vrot.slane %v1113_v18, %v3759_v31  ;;  %v1171_v18 = vrot.slane %v3850_v37, %v3745_v17  ;;  %v1149_v29 = vcombine.high %v3852_v40, %v3691_v27 }
 0x17d   :  { %5377 = vst [vmem:[#allocation52_spill] sm:$0xff] %v4325_v41  ;;  %2692 = vrot.lane.b32.xlu0 %v1081_v19, %s3703_s23 }
 0x17e   :  { %2696 = vrot.lane.b32.xlu1 %v1078_v6, %s5311_s24  ;;  %v1145_v39 = vcombine.high %v1121_v61, %v3691_v27  ;;  %v1156_v6 = vrot.slane %v3852_v40, %v3745_v17  ;;  %v1163_v37 = vrot.slane %v1149_v29, %v3745_v17 }
 0x17f   :  { %v4331_v1 = vpop.permute.xlu0 %2468 }
 0x180   :  { %5378 = vst [vmem:[#allocation53_spill] sm:$0xff] %v4331_v1  ;;  %v4335_v52 = vpop.permute.xlu1 %2472 }
 0x181   :  { %5379 = vst [vmem:[#allocation54_spill] sm:$0xff] %v4335_v52  ;;  %2700 = vrot.lane.b32.xlu0 %v1082_v30, %s5303_s25 }
 0x182   :  { %2704 = vrot.lane.b32.xlu1 %v1121_v61, %s3706_s26  ;;  %v1137_v61 = vrot.slane %v1129_v46, %v3759_v31 }
 0x183   :  { %v4339_v19 = vpop.permute.xlu0 %2476 }
 0x184   :  { %5380 = vst [vmem:[#allocation55_spill] sm:$0xff] %v4339_v19  ;;  %v4343_v20 = vpop.permute.xlu1 %2480  ;;  %v1146_v19 = vcombine.high %v1128_v45, %v3691_v27 }
 0x185   :  { %5381 = vst [vmem:[#allocation56_spill] sm:$0xff] %v4343_v20  ;;  %2708 = vrot.lane.b32.xlu0 %v1145_v39, %s3707_s27  ;;  %v1179_v39 = vcombine.low %v1156_v6, %v1171_v18 }
 0x186   :  { %2712 = vrot.lane.b32.xlu1 %v1128_v45, %s5300_s28  ;;  %v1144_v45 = vrot.slane %v1130_v50, %v3759_v31  ;;  %s5386_s28 = smov 84  }
 0x187   :  { %v4351_v30 = vpop.permute.xlu0 %2484 }
 0x188   :  { %5382 = vst [vmem:[#allocation57_spill] sm:$0xff] %v4351_v30  ;;  %v4355_v15 = vpop.permute.xlu1 %2488  ;;  %v1147_v30 = vcombine.high %v1137_v61, %v3691_v27  ;;  %v1148_v40 = vcombine.high %v1144_v45, %v3691_v27 }
 0x189   :  { %5383 = vst [vmem:[#allocation58_spill] sm:$0xff] %v4355_v15  ;;  %2716 = vrot.lane.b32.xlu0 %v1146_v19, %s3709_s29  ;;  %v1178_v19 = vrot.slane %v1164_v16, %v3745_v17  ;;  %v1180_v15 = vcombine.high %v1156_v6, %v1171_v18  ;;  %v1237_v18 = vrot.slane %v3860_v48, %v3745_v17 }
 0x18a   :  { %2720 = vrot.lane.b32.xlu1 %v1137_v61, %s3710_s30  ;;  %v1222_v6 = vrot.slane %v3862_v49, %v3745_v17 }
 0x18b   :  { %v4363_v20 = vpop.permute.xlu0 %2492  ;;  %v1195_v50 = vcombine.low %v1163_v37, %v1178_v19  ;;  %v1194_v29 = vrot.slane %v1180_v15, %v3759_v31  ;;  %v1230_v15 = vcombine.high %v3860_v48, %v3691_v27 }
 0x18c   :  { %5384 = vst [vmem:[#allocation59_spill] sm:$0xff] %v4363_v20  ;;  %v4367_v46 = vpop.permute.xlu1 %2496  ;;  %v1187_v20 = vrot.slane %v1179_v39, %v3759_v31 }
 0x18d   :  { %5385 = vst [vmem:[#allocation60_spill] sm:$0xff] %v4367_v46  ;;  %2724 = vrot.lane.b32.xlu0 %v1147_v30, %s5386_s28 }
 0x18e   :  { %2728 = vrot.lane.b32.xlu1 %v1144_v45, %s3712_s3  ;;  %v1211_v16 = vcombine.high %v1187_v20, %v3691_v27  ;;  %v1196_v45 = vcombine.high %v1163_v37, %v1178_v19 }
 0x18f   :  { %v4373_v52 = vpop.permute.xlu0 %2500 }
 0x190   :  { %5387 = vst [vmem:[#allocation61_spill] sm:$0xff] %v4373_v52  ;;  %v4377_v61 = vpop.permute.xlu1 %2504  ;;  %v1245_v52 = vcombine.low %v1222_v6, %v1237_v18 }
 0x191   :  { %5388 = vst [vmem:[#allocation62_spill] sm:$0xff] %v4377_v61  ;;  %2732 = vrot.lane.b32.xlu0 %v1148_v40, %s3713_s4  ;;  %v1215_v61 = vcombine.high %v3862_v49, %v3691_v27 }
 0x192   :  { %2736 = vrot.lane.b32.xlu1 %v1187_v20, %s5369_s2  ;;  %v1203_v20 = vrot.slane %v1195_v50, %v3759_v31  ;;  %v1244_v50 = vrot.slane %v1230_v15, %v3745_v17  ;;  %v4412_v49 = vrot.slane %v1245_v52, %v3759_v31  ;;  %v1303_v15 = vrot.slane %v3872_v57, %v3745_v17 }
 0x193   :  { %v4381_v30 = vpop.permute.xlu0 %2508  ;;  %v1229_v48 = vrot.slane %v1215_v61, %v3745_v17 }
 0x194   :  { %5389 = vst [vmem:[#allocation63_spill] sm:$0xff] %v4381_v30  ;;  %v4389_v39 = vpop.permute.xlu1 %2512  ;;  %v1212_v30 = vcombine.high %v1194_v29, %v3691_v27  ;;  %v1213_v37 = vcombine.high %v1203_v20, %v3691_v27  ;;  %5392 = vst [vmem:[#allocation66_spill] sm:$0xff] %v4412_v49  ;;  %v1277_v61 = vcombine.high %v4412_v49, %v3691_v27 }
 0x195   :  { %5390 = vst [vmem:[#allocation64_spill] sm:$0xff] %v4389_v39  ;;  %2740 = vrot.lane.b32.xlu0 %v1211_v16, %s3715_s6  ;;  %v1210_v16 = vrot.slane %v1196_v45, %v3759_v31  ;;  %v1261_v39 = vcombine.low %v1229_v48, %v1244_v50  ;;  %v1262_v52 = vcombine.high %v1229_v48, %v1244_v50 }
 0x196   :  { %2744 = vrot.lane.b32.xlu1 %v1194_v29, %s3716_s7  ;;  %v1246_v29 = vcombine.high %v1222_v6, %v1237_v18  ;;  %v1296_v50 = vcombine.high %v3872_v57, %v3691_v27 }
 0x197   :  { %v4393_v40 = vpop.permute.xlu0 %2516  ;;  %v1269_v49 = vrot.slane %v1261_v39, %v3759_v31  ;;  %v1276_v2 = vrot.slane %v1262_v52, %v3759_v31 }
 0x198   :  { %5391 = vst [vmem:[#allocation65_spill] sm:$0xff] %v4393_v40  ;;  %v4401_v46 = vpop.permute.xlu1 %2520  ;;  %v1260_v18 = vrot.slane %v1246_v29, %v3759_v31  ;;  %v1281_v29 = vcombine.high %v3874_v60, %v3691_v27 }
 0x199   :  { %2748 = vrot.lane.b32.xlu0 %v1212_v30, %s3717_s8  ;;  %v1279_v41 = vcombine.high %v1269_v49, %v3691_v27 }
 0x19a   :  { %2752 = vrot.lane.b32.xlu1 %v1203_v20, %s5350_s5  ;;  %v1214_v20 = vcombine.high %v1210_v16, %v3691_v27  ;;  %v1278_v1 = vcombine.high %v1260_v18, %v3691_v27  ;;  %v1295_v57 = vrot.slane %v1281_v29, %v3745_v17 }
 0x19b   :  { %v4405_v19 = vpop.permute.xlu0 %2524 }
 0x19c   :  { %v4414_v40 = vpop.permute.xlu1 %2528 }
 0x19d   :  { %2756 = vrot.lane.b32.xlu0 %v1213_v37, %s3719_s11  ;;  %v1288_v37 = vrot.slane %v3874_v60, %v3745_v17  ;;  %v1280_v60 = vcombine.high %v1276_v2, %v3691_v27 }
 0x19e   :  { %2760 = vrot.lane.b32.xlu1 %v1210_v16, %s3720_s12 }
 0x19f   :  { %v4418_v30 = vpop.permute.xlu0 %2532 }
 0x1a0   :  { %v4421_v45 = vpop.permute.xlu1 %2536 }
 0x1a1   :  { %2764 = vrot.lane.b32.xlu0 %v1214_v20, %s5325_s9  ;;  %v1311_v20 = vcombine.low %v1288_v37, %v1303_v15 }
 0x1a2   :  { %2768 = vrot.lane.b32.xlu1 %v1277_v61, %s3694_s14 }
 0x1a3   :  { %v4428_v6 = vpop.permute.xlu0 %2540  ;;  %v1319_v55 = vrot.slane %v1311_v20, %v3759_v31  ;;  %v1354_v20 = vrot.slane %v3885_v4, %v3745_v17 }
 0x1a4   :  { %v4434_v16 = vpop.permute.xlu1 %2544 }
 0x1a5   :  { %2772 = vrot.lane.b32.xlu0 %v1260_v18, %s3688_s10  ;;  %v1312_v18 = vcombine.high %v1288_v37, %v1303_v15  ;;  %v1369_v15 = vrot.slane %v3883_v3, %v3745_v17 }
 0x1a6   :  { %2776 = vrot.lane.b32.xlu1 %v1278_v1, %s3692_s0  ;;  %v1310_v1 = vrot.slane %v1296_v50, %v3745_v17  ;;  %v1343_v50 = vcombine.high %v1319_v55, %v3691_v27 }
 0x1a7   :  { %v4442_v48 = vpop.permute.xlu0 %2548  ;;  %v1326_v29 = vrot.slane %v1312_v18, %v3759_v31 }
 0x1a8   :  { %v4446_v61 = vpop.permute.xlu1 %2552 }
 0x1a9   :  { %2780 = vrot.lane.b32.xlu0 %v1269_v49, %s3693_s13 }
 0x1aa   :  { %2784 = vrot.lane.b32.xlu1 %v1279_v41, %s3695_s15  ;;  %v1327_v41 = vcombine.low %v1295_v57, %v1310_v1 }
 0x1ab   :  { %v4453_v39 = vpop.permute.xlu0 %2556 }
 0x1ac   :  { %v4456_v22 = vpop.permute.xlu1 %2560 }
 0x1ad   :  { %2788 = vrot.lane.b32.xlu0 %v1276_v2, %s3696_s16  ;;  %v1328_v2 = vcombine.high %v1295_v57, %v1310_v1  ;;  %v1347_v1 = vcombine.high %v3885_v4, %v3691_v27  ;;  %v1377_v57 = vcombine.low %v1354_v20, %v1369_v15 }
 0x1ae   :  { %2792 = vrot.lane.b32.xlu1 %v1280_v60, %s3697_s17 }
 0x1af   :  { %v4462_v49 = vpop.permute.xlu0 %2564 }
 0x1b0   :  { %5393 = vst [vmem:[#allocation67_spill] sm:$0xff] %v4462_v49  ;;  %v4464_v52 = vpop.permute.xlu1 %2568  ;;  %v1335_v49 = vrot.slane %v1327_v41, %v3759_v31 }
 0x1b1   :  { %5394 = vst [vmem:[#allocation68_spill] sm:$0xff] %v4464_v52  ;;  %2796 = vrot.lane.b32.xlu0 %v1319_v55, %s3698_s18  ;;  %v1344_v52 = vcombine.high %v1326_v29, %v3691_v27  ;;  %v1362_v55 = vcombine.high %v3883_v3, %v3691_v27  ;;  %v1361_v3 = vrot.slane %v1347_v1, %v3745_v17 }
 0x1b2   :  { %2800 = vrot.lane.b32.xlu1 %v1343_v50, %s3699_s19 }
 0x1b3   :  { %v4472_v37 = vpop.permute.xlu0 %2572  ;;  %v1376_v41 = vrot.slane %v1362_v55, %v3745_v17 }
 0x1b4   :  { %5395 = vst [vmem:[#allocation69_spill] sm:$0xff] %v4472_v37  ;;  %v4476_v60 = vpop.permute.xlu1 %2576  ;;  %v1342_v37 = vrot.slane %v1328_v2, %v3759_v31 }
 0x1b5   :  { %5396 = vst [vmem:[#allocation70_spill] sm:$0xff] %v4476_v60  ;;  %2804 = vrot.lane.b32.xlu0 %v1326_v29, %s3700_s20  ;;  %v1345_v60 = vcombine.high %v1335_v49, %v3691_v27  ;;  %v1378_v29 = vcombine.high %v1354_v20, %v1369_v15  ;;  %v1393_v2 = vcombine.low %v1361_v3, %v1376_v41 }
 0x1b6   :  { %2808 = vrot.lane.b32.xlu1 %v1344_v52, %s3701_s21  ;;  %v1346_v4 = vcombine.high %v1342_v37, %v3691_v27  ;;  %v1394_v15 = vcombine.high %v1361_v3, %v1376_v41  ;;  %v1413_v3 = vcombine.high %v3894_v13, %v3691_v27 }
 0x1b7   :  { %v4484_v18 = vpop.permute.xlu0 %2580  ;;  %v1392_v1 = vrot.slane %v1378_v29, %v3759_v31 }
 0x1b8   :  { %5397 = vst [vmem:[#allocation71_spill] sm:$0xff] %v4484_v18  ;;  %v4488_v50 = vpop.permute.xlu1 %2584 }
 0x1b9   :  { %5398 = vst [vmem:[#allocation72_spill] sm:$0xff] %v4488_v50  ;;  %2812 = vrot.lane.b32.xlu0 %v1335_v49, %s3702_s22  ;;  %v1385_v50 = vrot.slane %v1377_v57, %v3759_v31  ;;  %v1420_v57 = vrot.slane %v3894_v13, %v3745_v17 }
 0x1ba   :  { %2816 = vrot.lane.b32.xlu1 %v1345_v60, %s3703_s23 }
 0x1bb   :  { %v4495_v52 = vpop.permute.xlu0 %2588  ;;  %v1409_v55 = vcombine.high %v1385_v50, %v3691_v27 }
 0x1bc   :  { %v4498_v18 = vpop.permute.xlu1 %2592 }
 0x1bd   :  { %2820 = vrot.lane.b32.xlu0 %v1342_v37, %s5311_s24  ;;  %v1435_v37 = vrot.slane %v3892_v10, %v3745_v17 }
 0x1be   :  { %2824 = vrot.lane.b32.xlu1 %v1346_v4, %s5303_s25  ;;  %s5403_s25 = smov 72  }
 0x1bf   :  { %v4504_v49 = vpop.permute.xlu0 %2596  ;;  %v1443_v29 = vcombine.low %v1420_v57, %v1435_v37 }
 0x1c0   :  { %5399 = vst [vmem:[#allocation73_spill] sm:$0xff] %v4504_v49  ;;  %v4506_v60 = vpop.permute.xlu1 %2600  ;;  %v1401_v49 = vrot.slane %v1393_v2, %v3759_v31 }
 0x1c1   :  { %5400 = vst [vmem:[#allocation74_spill] sm:$0xff] %v4506_v60  ;;  %2828 = vrot.lane.b32.xlu0 %v1385_v50, %s3706_s26  ;;  %v1410_v60 = vcombine.high %v1392_v1, %v3691_v27  ;;  %v1428_v50 = vcombine.high %v3892_v10, %v3691_v27 }
 0x1c2   :  { %2832 = vrot.lane.b32.xlu1 %v1409_v55, %s3707_s27 }
 0x1c3   :  { %v4512_v20 = vpop.permute.xlu0 %2604  ;;  %v1442_v2 = vrot.slane %v1428_v50, %v3745_v17 }
 0x1c4   :  { %5401 = vst [vmem:[#allocation75_spill] sm:$0xff] %v4512_v20  ;;  %v4518_v4 = vpop.permute.xlu1 %2608  ;;  %v1408_v20 = vrot.slane %v1394_v15, %v3759_v31 }
 0x1c5   :  { %5402 = vst [vmem:[#allocation76_spill] sm:$0xff] %v4518_v4  ;;  %2836 = vrot.lane.b32.xlu0 %v1392_v1, %s5403_s25  ;;  %v1411_v4 = vcombine.high %v1401_v49, %v3691_v27  ;;  %v1444_v1 = vcombine.high %v1420_v57, %v1435_v37 }
 0x1c6   :  { %2840 = vrot.lane.b32.xlu1 %v1410_v60, %s3709_s29  ;;  %v1427_v60 = vrot.slane %v1413_v3, %v3745_v17 }
 0x1c7   :  { %v4526_v41 = vpop.permute.xlu0 %2612  ;;  %v1458_v57 = vrot.slane %v1444_v1, %v3759_v31  ;;  %v1494_v1 = vcombine.high %v3904_v11, %v3691_v27 }
 0x1c8   :  { %5404 = vst [vmem:[#allocation77_spill] sm:$0xff] %v4526_v41  ;;  %v4530_v55 = vpop.permute.xlu1 %2616  ;;  %v1451_v41 = vrot.slane %v1443_v29, %v3759_v31 }
 0x1c9   :  { %5405 = vst [vmem:[#allocation78_spill] sm:$0xff] %v4530_v55  ;;  %2844 = vrot.lane.b32.xlu0 %v1401_v49, %s3710_s30  ;;  %v1412_v55 = vcombine.high %v1408_v20, %v3691_v27  ;;  %v3264_v49 = vsel %vm3263_vm0, %v3776_v42, %v4082_v62  ;;  %v1460_v42 = vcombine.high %v1427_v60, %v1442_v2 }
 0x1ca   :  { %2848 = vrot.lane.b32.xlu1 %v1411_v4, %s5386_s28  ;;  %v1459_v4 = vcombine.low %v1427_v60, %v1442_v2  ;;  %v1475_v37 = vcombine.high %v1451_v41, %v3691_v27  ;;  %v3266_v3 = vsel %vm3265_vm1, %v3264_v49, %v4053_v34  ;;  %v1501_v62 = vrot.slane %v3904_v11, %v3745_v17 }
 0x1cb   :  { %v4537_v10 = vpop.permute.xlu0 %2620  ;;  %v3325_v34 = vsel %vm3263_vm0, %v3925_v21, %v4234_v25  ;;  %v1476_v2 = vcombine.high %v1458_v57, %v3691_v27  ;;  %v1479_v49 = vcombine.high %v3909_v36, %v3691_v27  ;;  %v3356_v11 = vsel %vm3263_vm0, %v4076_v44, %v4401_v46 }
 0x1cc   :  { %v4540_v13 = vpop.permute.xlu1 %2624  ;;  %v1467_v60 = vrot.slane %v1459_v4, %v3759_v31  ;;  %v3326_v25 = vsel %vm3265_vm1, %v3325_v34, %v4236_v5  ;;  %v1474_v4 = vrot.slane %v1460_v42, %v3759_v31  ;;  %v1508_v5 = vrot.slane %v1494_v1, %v3745_v17 }
 0x1cd   :  { %2852 = vrot.lane.b32.xlu0 %v1408_v20, %s3712_s3  ;;  %v1486_v20 = vrot.slane %v3909_v36, %v3745_v17  ;;  %v1493_v42 = vrot.slane %v1479_v49, %v3745_v17 }
 0x1ce   :  { %2856 = vrot.lane.b32.xlu1 %v1412_v55, %s3713_s4  ;;  %v3268_v55 = vsel %vm3267_vm2, %v3266_v3, %v4065_v8 }
 0x1cf   :  { %v4549_v15 = vpop.permute.xlu0 %2628  ;;  %v1509_v8 = vcombine.low %v1486_v20, %v1501_v62  ;;  %v3270_v21 = vsel %vm3269_vm3, %v3268_v55, %v4078_v32  ;;  %v3357_v32 = vsel %vm3265_vm1, %v3356_v11, %v4405_v19  ;;  %v1510_v44 = vcombine.high %v1486_v20, %v1501_v62 }
 0x1d0   :  { %v4551_v50 = vpop.permute.xlu1 %2632  ;;  %v1478_v62 = vcombine.high %v1474_v4, %v3691_v27  ;;  %v1525_v49 = vcombine.low %v1493_v42, %v1508_v5  ;;  %v1526_v11 = vcombine.high %v1493_v42, %v1508_v5 }
 0x1d1   :  { %2860 = vrot.lane.b32.xlu0 %v1451_v41, %s5369_s2 }
 0x1d2   :  { %2864 = vrot.lane.b32.xlu1 %v1475_v37, %s3715_s6 }
 0x1d3   :  { %v4563_v29 = vpop.permute.xlu0 %2636 }
 0x1d4   :  { %v4570_v41 = vpop.permute.xlu1 %2640 }
 0x1d5   :  { %2868 = vrot.lane.b32.xlu0 %v1458_v57, %s3716_s7  ;;  %v3327_v57 = vsel %vm3267_vm2, %v3326_v25, %v4247_v58  ;;  %v3272_v58 = vsel %vm3271_vm4, %v3270_v21, %v4085_v54 }
 0x1d6   :  { %2872 = vrot.lane.b32.xlu1 %v1476_v2, %s3717_s8  ;;  %v1477_v2 = vcombine.high %v1467_v60, %v3691_v27  ;;  %v3328_v46 = vsel %vm3269_vm3, %v3327_v57, %v4249_v51  ;;  %v3274_v20 = vsel %vm3273_vm5, %v3272_v58, %v4092_v14  ;;  %v1524_v14 = vrot.slane %v1510_v44, %v3759_v31 }
 0x1d7   :  { %v2645_v37 = vpop.permute.xlu0 %2644  ;;  %v3329_v34 = vsel %vm3271_vm4, %v3328_v46, %v4254_v26  ;;  %v1545_v46 = vcombine.high %v3927_v56, %v3691_v27 }
 0x1d8   :  { %v3387_v36 = vsel %vm3263_vm0, %v4245_v7, %v2645_v37  ;;  %v2649_v3 = vpop.permute.xlu1 %2648  ;;  %v4602_v7 = vrot.slane %v1509_v8, %v3759_v31  ;;  %v3330_v26 = vsel %vm3273_vm5, %v3329_v34, %v4259_v9 }
 0x1d9   :  { %2876 = vrot.lane.b32.xlu0 %v1467_v60, %s5350_s5  ;;  %v3388_v19 = vsel %vm3265_vm1, %v3387_v36, %v2649_v3  ;;  %v3358_v60 = vsel %vm3267_vm2, %v3357_v32, %v4414_v40  ;;  %v3331_v25 = vsel %vm5327_vm6, %v3330_v26, %v4268_v0  ;;  %v1567_v36 = vrot.slane %v3916_v47, %v3745_v17 }
 0x1da   :  { %2880 = vrot.lane.b32.xlu1 %v1477_v2, %s3719_s11  ;;  %v3359_v51 = vsel %vm3269_vm3, %v3358_v60, %v4418_v30  ;;  %v1541_v21 = vcombine.high %v4602_v7, %v3691_v27  ;;  %v3276_v30 = vsel %vm5327_vm6, %v3274_v20, %v4098_v38  ;;  %v1552_v38 = vrot.slane %v3927_v56, %v3745_v17 }
 0x1db   :  { %v2653_v55 = vpop.permute.xlu0 %2652  ;;  %v3360_v37 = vsel %vm3271_vm4, %v3359_v51, %v4421_v45  ;;  %v1533_v0 = vrot.slane %v1525_v49, %v3759_v31  ;;  %v3278_v45 = vsel %vm5322_vm7, %v3276_v30, %v4106_v43  ;;  %v3332_v3 = vsel %vm5322_vm7, %v3331_v25, %v4271_v59  ;;  %v5407_v25 = vld [vmem:[#allocation67_spill] sm:$0xff] }
 0x1dc   :  { %v3389_v54 = vsel %vm3267_vm2, %v3388_v19, %v2653_v55  ;;  %v2657_v1 = vpop.permute.xlu1 %2656  ;;  %v3361_v57 = vsel %vm3273_vm5, %v3360_v37, %v4428_v6  ;;  %v1542_v2 = vcombine.high %v1524_v14, %v3691_v27  ;;  %v3333_v5 = vsel %vm5324_vm8, %v3332_v3, %v4279_v24  ;;  %v5408_v37 = vld [vmem:[#allocation28_spill] sm:$0xff]  ;;  %v5411_v3 = vld [vmem:[#allocation49_spill] sm:$0xff] }
 0x1dd   :  { %2884 = vrot.lane.b32.xlu0 %v1474_v4, %s3720_s12  ;;  %v3390_v40 = vsel %vm3269_vm3, %v3389_v54, %v2657_v1  ;;  %v3362_v42 = vsel %vm5327_vm6, %v3361_v57, %v4434_v16  ;;  %v1560_v43 = vcombine.high %v3916_v47, %v3691_v27  ;;  %v1575_v19 = vcombine.low %v1552_v38, %v1567_v36  ;;  %v5409_v57 = vld [vmem:[#allocation29_spill] sm:$0xff] }
 0x1de   :  { %2888 = vrot.lane.b32.xlu1 %v1478_v62, %s5325_s9  ;;  %v3363_v59 = vsel %vm5322_vm7, %v3362_v42, %v4442_v48  ;;  %v3280_v24 = vsel %vm5324_vm8, %v3278_v45, %v4110_v23  ;;  %v1540_v16 = vrot.slane %v1526_v11, %v3759_v31  ;;  %v3334_v55 = vsel %vm5323_vm9, %v3333_v5, %v4283_v12  ;;  %v5410_v11 = vld [vmem:[#allocation48_spill] sm:$0xff] }
 0x1df   :  { %v2661_v8 = vpop.permute.xlu0 %2660  ;;  %v3282_v47 = vsel %vm5323_vm9, %v3280_v24, %v4117_v35  ;;  %v1543_v60 = vcombine.high %v1533_v0, %v3691_v27  ;;  %v3335_v56 = vsel %vm5305_vm10, %v3334_v55, %v4289_v33  ;;  %v3364_v23 = vsel %vm5324_vm8, %v3363_v59, %v4446_v61 }
 0x1e0   :  { %v3391_v4 = vsel %vm3271_vm4, %v3390_v40, %v2661_v8  ;;  %v2665_v9 = vpop.permute.xlu1 %2664  ;;  %v4675_v35 = vrot.slane %v1560_v43, %v3745_v17  ;;  %v3365_v12 = vsel %vm5323_vm9, %v3364_v23, %v4453_v39  ;;  %v1559_v62 = vrot.slane %v1545_v46, %v3745_v17  ;;  %v5406_v8 = vld [vmem:[#allocation47_spill] sm:$0xff]  ;;  %v5414_v43 = vld [vmem:[#allocation69_spill] sm:$0xff] }
 0x1e1   :  { %2892 = vrot.lane.b32.xlu0 %v1541_v21, %s3694_s14  ;;  %v3392_v6 = vsel %vm3273_vm5, %v3391_v4, %v2665_v9  ;;  %v1576_v20 = vcombine.high %v1552_v38, %v1567_v36  ;;  %v3284_v33 = vsel %vm5305_vm10, %v3282_v47, %v4120_v63  ;;  %v1583_v61 = vrot.slane %v1575_v19, %v3759_v31  ;;  %v5415_v19 = vld [vmem:[#allocation10_spill] sm:$0xff] }
 0x1e2   :  { %2896 = vrot.lane.b32.xlu1 %v1524_v14, %s3688_s10  ;;  %v3286_v51 = vsel %vm5307_vm11, %v3284_v33, %v4126_v53  ;;  %v3336_v49 = vsel %vm5307_vm11, %v3335_v56, %v4293_v28  ;;  %v1544_v40 = vcombine.high %v1540_v16, %v3691_v27  ;;  %v3366_v63 = vsel %vm5305_vm10, %v3365_v12, %v4456_v22 }
 0x1e3   :  { %v2669_v32 = vpop.permute.xlu0 %2668  ;;  %v3337_v21 = vsel %vm5306_vm12, %v3336_v49, %v5406_v8  ;;  %v3367_v53 = vsel %vm5307_vm11, %v3366_v63, %v5407_v25  ;;  %v1591_v28 = vcombine.low %v1559_v62, %v4675_v35  ;;  %v3288_v4 = vsel %vm5306_vm12, %v3286_v51, %v5408_v37  ;;  %v5421_v49 = vld [vmem:[#allocation71_spill] sm:$0xff]  ;;  %v5422_v8 = vld [vmem:[#allocation32_spill] sm:$0xff] }
 0x1e4   :  { %v3393_v58 = vsel %vm5327_vm6, %v3392_v6, %v2669_v32  ;;  %v2673_v44 = vpop.permute.xlu1 %2672  ;;  %v1590_v9 = vrot.slane %v1576_v20, %v3759_v31  ;;  %v3290_v22 = vsel %vm5309_vm13, %v3288_v4, %v5409_v57  ;;  %v3338_v36 = vsel %vm5309_vm13, %v3337_v21, %v5410_v11  ;;  %v5424_v25 = vld [vmem:[#allocation52_spill] sm:$0xff] }
 0x1e5   :  { %2900 = vrot.lane.b32.xlu0 %v1542_v2, %s3692_s0  ;;  %v3394_v48 = vsel %vm5322_vm7, %v3393_v58, %v2673_v44  ;;  %v1607_v45 = vcombine.high %v1583_v61, %v3691_v27  ;;  %v3339_v6 = vsel %vm5308_vm14, %v3338_v36, %v5411_v3  ;;  %v5412_v2 = vld [vmem:[#allocation68_spill] sm:$0xff]  ;;  %v1592_v46 = vcombine.high %v1559_v62, %v4675_v35  ;;  %v5419_v35 = vld [vmem:[#allocation51_spill] sm:$0xff]  ;;  %v5420_v62 = vld [vmem:[#allocation70_spill] sm:$0xff] }
 0x1e6   :  { %2904 = vrot.lane.b32.xlu1 %v1533_v0, %s3693_s13  ;;  %v3368_v32 = vsel %vm5306_vm12, %v3367_v53, %v5412_v2  ;;  %v5413_v58 = vld [vmem:[#allocation8_spill] sm:$0xff]  ;;  %v4725_v24 = vrot.slane %v5415_v19, %v3745_v17  ;;  %v1599_v55 = vrot.slane %v1591_v28, %v3759_v31  ;;  %v5427_v2 = vld [vmem:[#allocation34_spill] sm:$0xff] }
 0x1e7   :  { %v2677_v34 = vpop.permute.xlu0 %2676  ;;  %v4717_v44 = vrot.slane %v5413_v58, %v3745_v17  ;;  %v3369_v59 = vsel %vm5309_vm13, %v3368_v32, %v5414_v43  ;;  %v1626_v51 = vcombine.high %v5413_v58, %v3691_v27  ;;  %v1606_v63 = vrot.slane %v1592_v46, %v3759_v31  ;;  %v5429_v43 = vld [vmem:[#allocation54_spill] sm:$0xff] }
 0x1e8   :  { %v3395_v54 = vsel %vm5324_vm8, %v3394_v48, %v2677_v34  ;;  %v2681_v1 = vpop.permute.xlu1 %2680  ;;  %v5417_v48 = vld [vmem:[#allocation31_spill] sm:$0xff]  ;;  %v3370_v20 = vsel %vm5308_vm14, %v3369_v59, %v5420_v62  ;;  %v1609_v4 = vcombine.high %v1599_v55, %v3691_v27 }
 0x1e9   :  { %2908 = vrot.lane.b32.xlu0 %v1543_v60, %s3695_s15  ;;  %v3396_v39 = vsel %vm5323_vm9, %v3395_v54, %v2681_v1  ;;  %v5418_v60 = vld [vmem:[#allocation50_spill] sm:$0xff]  ;;  %v1608_v1 = vcombine.high %v1590_v9, %v3691_v27 }
 0x1ea   :  { %2912 = vrot.lane.b32.xlu1 %v1540_v16, %s3696_s16  ;;  %v5416_v16 = vld [vmem:[#allocation30_spill] sm:$0xff]  ;;  %v3340_v56 = vsel %vm5315_vm15, %v3339_v6, %v5418_v60  ;;  %v1642_v6 = vcombine.high %v4725_v24, %v4717_v44 }
 0x1eb   :  { %v2685_v26 = vpop.permute.xlu0 %2684  ;;  %v3292_v47 = vsel %vm5308_vm14, %v3290_v22, %v5416_v16  ;;  %v5426_v22 = vld [vmem:[#allocation72_spill] sm:$0xff] }
 0x1ec   :  { %v3397_v14 = vsel %vm5305_vm10, %v3396_v39, %v2685_v26  ;;  %v2689_v30 = vpop.permute.xlu1 %2688  ;;  %vm5310_vm10 = vcmask 556032   ;;  %v3294_v34 = vsel %vm5315_vm15, %v3292_v47, %v5417_v48  ;;  %v3371_v39 = vsel %vm5315_vm15, %v3370_v20, %v5421_v49  ;;  %v5431_v48 = vld [vmem:[#allocation73_spill] sm:$0xff]  ;;  %v5437_v49 = vld [vmem:[#allocation74_spill] sm:$0xff] }
 0x1ed   :  { %2916 = vrot.lane.b32.xlu0 %v1544_v40, %s3697_s17  ;;  %v3398_v38 = vsel %vm5307_vm11, %v3397_v14, %v2689_v30  ;;  %v3341_v12 = vsel %vm5310_vm10, %v3340_v56, %v5419_v35  ;;  %vm5314_vm11 = vcmask 621568   ;;  %v1611_v26 = vcombine.high %v5415_v19, %v3691_v27  ;;  %v5423_v14 = vld [vmem:[#allocation33_spill] sm:$0xff]  ;;  %v5433_v56 = vld [vmem:[#allocation36_spill] sm:$0xff] }
 0x1ee   :  { %2920 = vrot.lane.b32.xlu1 %v1583_v61, %s3698_s18  ;;  %v1641_v40 = vcombine.low %v4725_v24, %v4717_v44  ;;  %v3296_v21 = vsel %vm5310_vm10, %v3294_v34, %v5422_v8  ;;  %v3372_v11 = vsel %vm5310_vm10, %v3371_v39, %v5426_v22  ;;  %v1610_v19 = vcombine.high %v1606_v63, %v3691_v27  ;;  %v5430_v44 = vld [vmem:[#allocation55_spill] sm:$0xff]  ;;  %v5435_v35 = vld [vmem:[#allocation56_spill] sm:$0xff]  ;;  %v5443_v22 = vld [vmem:[#allocation58_spill] sm:$0xff] }
 0x1ef   :  { %v2693_v0 = vpop.permute.xlu0 %2692  ;;  %v1625_v3 = vrot.slane %v1611_v26, %v3745_v17 }
 0x1f0   :  { %v3399_v5 = vsel %vm5306_vm12, %v3398_v38, %v2693_v0  ;;  %v2697_v42 = vpop.permute.xlu1 %2696  ;;  %vm5313_vm12 = vcmask 588800   ;;  %v4767_v0 = vrot.slane %v1626_v51, %v3745_v17 }
 0x1f1   :  { %2924 = vrot.lane.b32.xlu0 %v1607_v45, %s3699_s19  ;;  %v3400_v23 = vsel %vm5309_vm13, %v3399_v5, %v2697_v42  ;;  %v3298_v30 = vsel %vm5313_vm12, %v3296_v21, %v5423_v14  ;;  %v3342_v53 = vsel %vm5313_vm12, %v3341_v12, %v5424_v25  ;;  %vm5316_vm13 = vcmask 687104   ;;  %v5428_v42 = vld [vmem:[#allocation35_spill] sm:$0xff]  ;;  %v5439_v14 = vld [vmem:[#allocation9_spill] sm:$0xff]  ;;  %v5440_v25 = vld [vmem:[#allocation12_spill] sm:$0xff] }
 0x1f2   :  { %2928 = vrot.lane.b32.xlu1 %v1590_v9, %s3700_s20  ;;  %v5425_v9 = vld [vmem:[#allocation53_spill] sm:$0xff]  ;;  %v3373_v45 = vsel %vm5313_vm12, %v3372_v11, %v4495_v52  ;;  %v3300_v32 = vsel %vm5314_vm11, %v3298_v30, %v5427_v2  ;;  %v1649_v5 = vrot.slane %v1641_v40, %v3759_v31  ;;  %v1657_v60 = vcombine.low %v1625_v3, %v4767_v0  ;;  %v5438_v21 = vld [vmem:[#allocation75_spill] sm:$0xff] }
 0x1f3   :  { %v2701_v54 = vpop.permute.xlu0 %2700  ;;  %v3343_v57 = vsel %vm5314_vm11, %v3342_v53, %v5425_v9  ;;  %v3374_v16 = vsel %vm5314_vm11, %v3373_v45, %v4498_v18  ;;  %v1658_v8 = vcombine.high %v1625_v3, %v4767_v0  ;;  %v1699_v30 = vrot.slane %v5439_v14, %v3745_v17  ;;  %v5442_v9 = vld [vmem:[#allocation39_spill] sm:$0xff] }
 0x1f4   :  { %v3401_v33 = vsel %vm5308_vm14, %v3400_v23, %v2701_v54  ;;  %v2705_v61 = vpop.permute.xlu1 %2704  ;;  %vm5317_vm14 = vcmask 654336   ;;  %v1673_v54 = vcombine.high %v1649_v5, %v3691_v27  ;;  %v1684_v53 = vrot.slane %v5440_v25, %v3745_v17  ;;  %v5444_v45 = vld [vmem:[#allocation59_spill] sm:$0xff] }
 0x1f5   :  { %2932 = vrot.lane.b32.xlu0 %v1608_v1, %s3701_s21  ;;  %v3402_v28 = vsel %vm5315_vm15, %v3401_v33, %v2705_v61  ;;  %v3302_v58 = vsel %vm5317_vm14, %v3300_v32, %v5428_v42  ;;  %v3344_v52 = vsel %vm5317_vm14, %v3343_v57, %v5429_v43  ;;  %v3375_v34 = vsel %vm5317_vm14, %v3374_v16, %v5431_v48  ;;  %v5434_v1 = vld [vmem:[#allocation37_spill] sm:$0xff] }
 0x1f6   :  { %2936 = vrot.lane.b32.xlu1 %v1599_v55, %s3702_s22  ;;  %v3345_v24 = vsel %vm5316_vm13, %v3344_v52, %v5430_v44  ;;  %v3304_v23 = vsel %vm5316_vm13, %v3302_v58, %v5433_v56  ;;  %v1656_v33 = vrot.slane %v1642_v6, %v3759_v31  ;;  %v5436_v61 = vld [vmem:[#allocation57_spill] sm:$0xff]  ;;  %v3376_v39 = vsel %vm5316_vm13, %v3375_v34, %v5437_v49  ;;  %v5445_v6 = vld [vmem:[#allocation76_spill] sm:$0xff] }
 0x1f7   :  { %v2709_v37 = vpop.permute.xlu0 %2708  ;;  %vm5320_vm15 = vcmask 818176   ;;  %v1692_v42 = vcombine.high %v5439_v14, %v3691_v27  ;;  %v5446_v58 = vld [vmem:[#allocation77_spill] sm:$0xff]  ;;  %v1677_v52 = vcombine.high %v5440_v25, %v3691_v27  ;;  %v1672_v44 = vrot.slane %v1658_v8, %v3759_v31  ;;  %v5455_v14 = vld [vmem:[#allocation63_spill] sm:$0xff] }
 0x1f8   :  { %v3403_v36 = vsel %vm5310_vm10, %v3402_v28, %v2709_v37  ;;  %v2713_v38 = vpop.permute.xlu1 %2712  ;;  %vm5319_vm10 = vcmask 719872   ;;  %v5441_v28 = vld [vmem:[#allocation38_spill] sm:$0xff]  ;;  %v1674_v0 = vcombine.high %v1656_v33, %v3691_v27  ;;  %v5450_v56 = vld [vmem:[#allocation61_spill] sm:$0xff] }
 0x1f9   :  { %2940 = vrot.lane.b32.xlu0 %v1609_v4, %s3703_s23  ;;  %v3404_v59 = vsel %vm5313_vm12, %v3403_v36, %v2713_v38  ;;  %vm5318_vm12 = vcmask 752640   ;;  %v3306_v18 = vsel %vm5319_vm10, %v3304_v23, %v5434_v1  ;;  %v3346_v12 = vsel %vm5319_vm10, %v3345_v24, %v5435_v35  ;;  %v5448_v24 = vld [vmem:[#allocation41_spill] sm:$0xff] }
 0x1fa   :  { %2944 = vrot.lane.b32.xlu1 %v1606_v63, %s5311_s24  ;;  %s5432_s24 = smov 60   ;;  %v3347_v51 = vsel %vm5318_vm12, %v3346_v12, %v5436_v61  ;;  %v3377_v63 = vsel %vm5319_vm10, %v3376_v39, %v5438_v21  ;;  %v3308_v37 = vsel %vm5318_vm12, %v3306_v18, %v5441_v28  ;;  %v1665_v4 = vrot.slane %v1657_v60, %v3759_v31  ;;  %v5452_v61 = vld [vmem:[#allocation42_spill] sm:$0xff]  ;;  %v5453_v39 = vld [vmem:[#allocation43_spill] sm:$0xff] }
 0x1fb   :  { %v2717_v46 = vpop.permute.xlu0 %2716  ;;  %v3378_v2 = vsel %vm5318_vm12, %v3377_v63, %v5445_v6  ;;  %v1706_v12 = vrot.slane %v1692_v42, %v3745_v17  ;;  %v1676_v63 = vcombine.high %v1672_v44, %v3691_v27 }
 0x1fc   :  { %v3405_v47 = vsel %vm5314_vm11, %v3404_v59, %v2717_v46  ;;  %v2721_v55 = vpop.permute.xlu1 %2720  ;;  %vm5321_vm11 = vcmask 785408   ;;  %v1707_v59 = vcombine.low %v1684_v53, %v1699_v30  ;;  %v5447_v46 = vld [vmem:[#allocation40_spill] sm:$0xff]  ;;  %v1675_v60 = vcombine.high %v1665_v4, %v3691_v27 }
 0x1fd   :  { %2948 = vrot.lane.b32.xlu0 %v1610_v19, %s5432_s24  ;;  %v3406_v62 = vsel %vm5317_vm14, %v3405_v47, %v2721_v55  ;;  %v3310_v57 = vsel %vm5321_vm11, %v3308_v37, %v5442_v9  ;;  %v3348_v11 = vsel %vm5321_vm11, %v3347_v51, %v5443_v22  ;;  %vm3315_vm14 = vcmask 883712   ;;  %v5449_v47 = vld [vmem:[#allocation60_spill] sm:$0xff]  ;;  %v5456_v9 = vld [vmem:[#allocation11_spill] sm:$0xff] }
 0x1fe   :  { %2952 = vrot.lane.b32.xlu1 %v1649_v5, %s3706_s26  ;;  %v3349_v3 = vsel %vm5320_vm15, %v3348_v11, %v5444_v45  ;;  %v3379_v43 = vsel %vm5321_vm11, %v3378_v2, %v5446_v58  ;;  %v3312_v19 = vsel %vm5320_vm15, %v3310_v57, %v5447_v46  ;;  %v1715_v49 = vrot.slane %v1707_v59, %v3759_v31  ;;  %v5457_v22 = vld [vmem:[#allocation44_spill] sm:$0xff]  ;;  %v5460_v2 = vld [vmem:[#allocation15_spill] sm:$0xff] }
 0x1ff   :  { %v2725_v20 = vpop.permute.xlu0 %2724  ;;  %v1765_v57 = vrot.slane %v5456_v9, %v3745_v17 }
 0x200   :  { %v3407_v26 = vsel %vm5316_vm13, %v3406_v62, %v2725_v20  ;;  %v2729_v40 = vpop.permute.xlu1 %2728  ;;  %vm3313_vm13 = vcmask 850944   ;;  %v1691_v20 = vrot.slane %v1677_v52, %v3745_v17  ;;  %v1739_v6 = vcombine.high %v1715_v49, %v3691_v27 }
 0x201   :  { %2956 = vrot.lane.b32.xlu0 %v1673_v54, %s3707_s27  ;;  %v3408_v36 = vsel %vm5319_vm10, %v3407_v26, %v2729_v40  ;;  %v3314_v16 = vsel %vm3313_vm13, %v3312_v19, %v5448_v24  ;;  %v3350_v55 = vsel %vm3313_vm13, %v3349_v3, %v5449_v47  ;;  %v5451_v54 = vld [vmem:[#allocation78_spill] sm:$0xff]  ;;  %vm5330_vm10 = vcmask 949248  }
 0x202   :  { %2960 = vrot.lane.b32.xlu1 %v1656_v33, %s5403_s25  ;;  %v3351_v23 = vsel %vm3315_vm14, %v3350_v55, %v5450_v56  ;;  %v3380_v1 = vsel %vm5320_vm15, %v3379_v43, %v5451_v54  ;;  %v1708_v33 = vcombine.high %v1684_v53, %v1699_v30  ;;  %v3316_v51 = vsel %vm3315_vm14, %v3314_v16, %v5452_v61  ;;  %v5454_v40 = vld [vmem:[#allocation62_spill] sm:$0xff] }
 0x203   :  { %v2733_v38 = vpop.permute.xlu0 %2732  ;;  %v3381_v62 = vsel %vm3313_vm13, %v3380_v1, %v4537_v10  ;;  %v1724_v46 = vcombine.high %v1691_v20, %v1706_v12  ;;  %v1758_v19 = vcombine.high %v5456_v9, %v3691_v27 }
 0x204   :  { %v3409_v32 = vsel %vm5318_vm12, %v3408_v36, %v2733_v38  ;;  %v2737_v5 = vpop.permute.xlu1 %2736  ;;  %vm3317_vm12 = vcmask 916480   ;;  %v3382_v25 = vsel %vm3315_vm14, %v3381_v62, %v4540_v13  ;;  %v1722_v13 = vrot.slane %v1708_v33, %v3759_v31  ;;  %v5458_v36 = vld [vmem:[#allocation45_spill] sm:$0xff]  ;;  %v5463_v62 = vld [vmem:[#allocation66_spill] sm:$0xff] }
 0x205   :  { %2964 = vrot.lane.b32.xlu0 %v1674_v0, %s3709_s29  ;;  %v3410_v48 = vsel %vm5321_vm11, %v3409_v32, %v2737_v5  ;;  %v3318_v26 = vsel %vm3317_vm12, %v3316_v51, %v5453_v39  ;;  %v3352_v8 = vsel %vm3317_vm12, %v3351_v23, %v5454_v40  ;;  %vm5328_vm11 = vcmask 1014784   ;;  %v5459_v0 = vld [vmem:[#allocation64_spill] sm:$0xff]  ;;  %v5461_v5 = vld [vmem:[#allocation65_spill] sm:$0xff] }
 0x206   :  { %2968 = vrot.lane.b32.xlu1 %v1665_v4, %s3710_s30  ;;  %v3353_v30 = vsel %vm5330_vm10, %v3352_v8, %v5455_v14  ;;  %v3383_v37 = vsel %vm3317_vm12, %v3382_v25, %v4549_v15  ;;  %v1723_v4 = vcombine.low %v1691_v20, %v1706_v12  ;;  %v3320_v11 = vsel %vm5330_vm10, %v3318_v26, %v5457_v22  ;;  %v5465_v22 = vld [vmem:[#allocation17_spill] sm:$0xff] }
 0x207   :  { %v2741_v34 = vpop.permute.xlu0 %2740  ;;  %v1750_v32 = vrot.slane %v5460_v2, %v3745_v17  ;;  %v3384_v58 = vsel %vm5330_vm10, %v3383_v37, %v4551_v50  ;;  %v1740_v55 = vcombine.high %v1722_v13, %v3691_v27  ;;  %v1772_v1 = vrot.slane %v1758_v19, %v3745_v17  ;;  %v5464_v37 = vld [vmem:[#allocation13_spill] sm:$0xff] }
 0x208   :  { %v3411_v18 = vsel %vm5320_vm15, %v3410_v48, %v2741_v34  ;;  %v2745_v35 = vpop.permute.xlu1 %2744  ;;  %vm5329_vm15 = vcmask 982016   ;;  %v1731_v48 = vrot.slane %v1723_v4, %v3759_v31  ;;  %v1831_v4 = vrot.slane %v5464_v37, %v3745_v17 }
 0x209   :  { %2972 = vrot.lane.b32.xlu0 %v1675_v60, %s5386_s28  ;;  %v3412_v10 = vsel %vm3313_vm13, %v3411_v18, %v2745_v35  ;;  %v3322_v38 = vsel %vm5329_vm15, %v3320_v11, %v5458_v36  ;;  %v3354_v45 = vsel %vm5329_vm15, %v3353_v30, %v5459_v0  ;;  %v3385_v59 = vsel %vm5329_vm15, %v3384_v58, %v4563_v29 }
 0x20a   :  { %2976 = vrot.lane.b32.xlu1 %v1672_v44, %s3712_s3  ;;  %v3355_v42 = vsel %vm5328_vm11, %v3354_v45, %v5461_v5  ;;  %v5462_v44 = vld [vmem:[#allocation46_spill] sm:$0xff]  ;;  %v1743_v29 = vcombine.high %v5460_v2, %v3691_v27  ;;  %v1773_v34 = vcombine.low %v1750_v32, %v1765_v57  ;;  %v3386_v60 = vsel %vm5328_vm11, %v3385_v59, %v4570_v41 }
 0x20b   :  { %v2749_v21 = vpop.permute.xlu0 %2748  ;;  %v3324_v24 = vsel %vm5328_vm11, %v3322_v38, %v5462_v44  ;;  %v1738_v18 = vrot.slane %v1724_v46, %v3759_v31  ;;  %v1741_v33 = vcombine.high %v1731_v48, %v3691_v27  ;;  %v1774_v51 = vcombine.high %v1750_v32, %v1765_v57 }
 0x20c   :  { %v3413_v53 = vsel %vm3315_vm14, %v3412_v10, %v2749_v21  ;;  %v2753_v28 = vpop.permute.xlu1 %2752  ;;  %v3550_v16 = vcombine.low %v3324_v24, %v3355_v42  ;;  %v1757_v61 = vrot.slane %v1743_v29, %v3745_v17  ;;  %v1816_v11 = vrot.slane %v5465_v22, %v3745_v17 }
 0x20d   :  { %2980 = vrot.lane.b32.xlu0 %v1676_v63, %s3713_s4  ;;  %v3414_v15 = vsel %vm3317_vm12, %v3413_v53, %v2753_v28  ;;  %v1742_v21 = vcombine.high %v1738_v18, %v3691_v27  ;;  %v1788_v53 = vrot.slane %v1774_v51, %v3759_v31  ;;  %v1824_v45 = vcombine.high %v5464_v37, %v3691_v27 }
 0x20e   :  { %2984 = vrot.lane.b32.xlu1 %v1715_v49, %s5369_s2  ;;  %v3558_v35 = vrot.slane %v3550_v16, %v3745_v17  ;;  %v4923_v49 = vrot.slane %v1773_v34, %v3759_v31  ;;  %v1789_v63 = vcombine.low %v1757_v61, %v1772_v1  ;;  %v1790_v28 = vcombine.high %v1757_v61, %v1772_v1 }
 0x20f   :  { %v2757_v3 = vpop.permute.xlu0 %2756  ;;  %v1806_v38 = vcombine.high %v1788_v53, %v3691_v27  ;;  %v1839_v2 = vcombine.low %v1816_v11, %v1831_v4  ;;  %v1840_v19 = vcombine.high %v1816_v11, %v1831_v4 }
 0x210   :  { %v3415_v43 = vsel %vm5330_vm10, %v3414_v15, %v2757_v3  ;;  %v2761_v52 = vpop.permute.xlu1 %2760  ;;  %v1805_v25 = vcombine.high %v4923_v49, %v3691_v27  ;;  %v1797_v0 = vrot.slane %v1789_v63, %v3759_v31  ;;  %v1809_v15 = vcombine.high %v5465_v22, %v3691_v27 }
 0x211   :  { %2988 = vrot.lane.b32.xlu0 %v1739_v6, %s3715_s6  ;;  %v3416_v50 = vsel %vm5329_vm15, %v3415_v43, %v2761_v52  ;;  %v1804_v58 = vrot.slane %v1790_v28, %v3759_v31  ;;  %v1838_v43 = vrot.slane %v1824_v45, %v3745_v17 }
 0x212   :  { %2992 = vrot.lane.b32.xlu1 %v1722_v13, %s3716_s7  ;;  %v1807_v42 = vcombine.high %v1797_v0, %v3691_v27  ;;  %v1823_v52 = vrot.slane %v1809_v15, %v3745_v17 }
 0x213   :  { %v2765_v47 = vpop.permute.xlu0 %2764  ;;  %v1808_v16 = vcombine.high %v1804_v58, %v3691_v27 }
 0x214   :  { %v3417_v56 = vsel %vm5328_vm11, %v3416_v50, %v2765_v47  ;;  %v2769_v23 = vpop.permute.xlu1 %2768  ;;  %v1847_v50 = vrot.slane %v1839_v2, %v3759_v31  ;;  %v1855_v47 = vcombine.low %v1823_v52, %v1838_v43 }
 0x215   :  { %v3551_v54 = vcombine.low %v3386_v60, %v3417_v56  ;;  %2996 = vrot.lane.b32.xlu0 %v1740_v55, %s3717_s8  ;;  %v3418_v20 = vsel %vm3263_vm0, %v5463_v62, %v2769_v23  ;;  %v5466_v55 = vld [vmem:[#allocation18_spill] sm:$0xff]  ;;  %v5468_v60 = vld [vmem:[#allocation23_spill] sm:$0xff] }
 0x216   :  { %3000 = vrot.lane.b32.xlu1 %v1731_v48, %s5350_s5  ;;  %v2029_v48 = vrot.slane %v5466_v55, %v3745_v17  ;;  %v2014_v56 = vrot.slane %v5468_v60, %v3745_v17  ;;  %v1871_v1 = vcombine.high %v1847_v50, %v3691_v27 }
 0x217   :  { %v3565_v12 = vrot.slane %v3551_v54, %v3745_v17  ;;  %v2773_v41 = vpop.permute.xlu0 %2772 }
 0x218   :  { %v3419_v39 = vsel %vm3265_vm1, %v3418_v20, %v2773_v41  ;;  %v2777_v26 = vpop.permute.xlu1 %2776  ;;  %v2037_v41 = vcombine.low %v2014_v56, %v2029_v48  ;;  %v2038_v63 = vcombine.high %v2014_v56, %v2029_v48 }
 0x219   :  { %3004 = vrot.lane.b32.xlu0 %v1741_v33, %s3719_s11  ;;  %v3566_v40 = vcombine.low %v3558_v35, %v3565_v12  ;;  %v3420_v8 = vsel %vm3267_vm2, %v3419_v39, %v2777_v26  ;;  %v2022_v35 = vcombine.high %v5466_v55, %v3691_v27  ;;  %v2007_v12 = vcombine.high %v5468_v60, %v3691_v27 }
 0x21a   :  { %3008 = vrot.lane.b32.xlu1 %v1738_v18, %s3720_s12  ;;  %v1854_v18 = vrot.slane %v1840_v19, %v3759_v31  ;;  %v1863_v39 = vrot.slane %v1855_v47, %v3759_v31  ;;  %v1856_v26 = vcombine.high %v1823_v52, %v1838_v43 }
 0x21b   :  { %v2781_v10 = vpop.permute.xlu0 %2780  ;;  %3586 = vst [vmem:[#allocation5] sm:$0xff] %v3566_v40  ;;  %v2036_v40 = vrot.slane %v2022_v35, %v3745_v17 }
 0x21c   :  { %v3421_v14 = vsel %vm3269_vm3, %v3420_v8, %v2781_v10  ;;  %v2785_v30 = vpop.permute.xlu1 %2784  ;;  %v1872_v51 = vcombine.high %v1854_v18, %v3691_v27  ;;  %v2021_v8 = vrot.slane %v2007_v12, %v3745_v17  ;;  %v4996_v4 = vrot.slane %v1856_v26, %v3759_v31 }
 0x21d   :  { %3012 = vrot.lane.b32.xlu0 %v1742_v21, %s5325_s9  ;;  %v3422_v9 = vsel %vm3271_vm4, %v3421_v14, %v2785_v30  ;;  %v4988_v14 = vrot.slane %v2037_v41, %v3759_v31  ;;  %s5476_s9 = smov 56  }
 0x21e   :  { %3016 = vrot.lane.b32.xlu1 %v1805_v25, %s3694_s14 }
 0x21f   :  { %v2789_v57 = vpop.permute.xlu0 %2788  ;;  %v2069_v11 = vcombine.high %v4988_v14, %v3691_v27 }
 0x220   :  { %v3423_v13 = vsel %vm3273_vm5, %v3422_v9, %v2789_v57  ;;  %v2793_v36 = vpop.permute.xlu1 %2792  ;;  %v2053_v9 = vcombine.low %v2021_v8, %v2036_v40 }
 0x221   :  { %3020 = vrot.lane.b32.xlu0 %v1788_v53, %s3688_s10  ;;  %v3424_v3 = vsel %vm5327_vm6, %v3423_v13, %v2793_v36  ;;  %v1873_v53 = vcombine.high %v1863_v39, %v3691_v27  ;;  %v2052_v13 = vrot.slane %v2038_v63, %v3759_v31  ;;  %v2054_v36 = vcombine.high %v2021_v8, %v2036_v40 }
 0x222   :  { %3024 = vrot.lane.b32.xlu1 %v1806_v38, %s3692_s0  ;;  %v5477_v38 = vld [vmem:[#allocation20_spill] sm:$0xff] }
 0x223   :  { %v2797_v6 = vpop.permute.xlu0 %2796 }
 0x224   :  { %v3425_v32 = vsel %vm5322_vm7, %v3424_v3, %v2797_v6  ;;  %v2801_v5 = vpop.permute.xlu1 %2800  ;;  %vm5467_vm7 = vcmask 359424   ;;  %v5479_v3 = vld [vmem:[#allocation25_spill] sm:$0xff] }
 0x225   :  { %3028 = vrot.lane.b32.xlu0 %v1797_v0, %s3693_s13  ;;  %v3426_v59 = vsel %vm5324_vm8, %v3425_v32, %v2801_v5  ;;  %vm5472_vm8 = vcmask 490496   ;;  %v2095_v0 = vrot.slane %v5477_v38, %v3745_v17  ;;  %v2080_v6 = vrot.slane %v5479_v3, %v3745_v17 }
 0x226   :  { %3032 = vrot.lane.b32.xlu1 %v1807_v42, %s3695_s15  ;;  %v2070_v5 = vcombine.high %v2052_v13, %v3691_v27  ;;  %v2061_v42 = vrot.slane %v2053_v9, %v3759_v31  ;;  %v2073_v43 = vcombine.high %v5479_v3, %v3691_v27  ;;  %v1874_v3 = vcombine.high %v4996_v4, %v3691_v27 }
 0x227   :  { %v2805_v46 = vpop.permute.xlu0 %2804 }
 0x228   :  { %v3427_v44 = vsel %vm5323_vm9, %v3426_v59, %v2805_v46  ;;  %v2809_v24 = vpop.permute.xlu1 %2808  ;;  %vm5469_vm9 = vcmask 392192   ;;  %v2103_v46 = vcombine.low %v2080_v6, %v2095_v0  ;;  %v2087_v47 = vrot.slane %v2073_v43, %v3745_v17 }
 0x229   :  { %3036 = vrot.lane.b32.xlu0 %v1804_v58, %s3696_s16  ;;  %v3428_v29 = vsel %vm5467_vm7, %v3427_v44, %v2809_v24  ;;  %vm5470_vm7 = vcmask 424960   ;;  %v2088_v58 = vcombine.high %v5477_v38, %v3691_v27  ;;  %v2071_v24 = vcombine.high %v2061_v42, %v3691_v27 }
 0x22a   :  { %3040 = vrot.lane.b32.xlu1 %v1808_v16, %s3697_s17  ;;  %v2068_v16 = vrot.slane %v2054_v36, %v3759_v31 }
 0x22b   :  { %v2813_v34 = vpop.permute.xlu0 %2812 }
 0x22c   :  { %v3429_v23 = vsel %vm5469_vm9, %v3428_v29, %v2813_v34  ;;  %v2817_v54 = vpop.permute.xlu1 %2816  ;;  %vm5471_vm9 = vcmask 457728   ;;  %v2104_v29 = vcombine.high %v2080_v6, %v2095_v0  ;;  %v2072_v56 = vcombine.high %v2068_v16, %v3691_v27 }
 0x22d   :  { %3044 = vrot.lane.b32.xlu0 %v1847_v50, %s3698_s18  ;;  %v3430_v62 = vsel %vm5470_vm7, %v3429_v23, %v2817_v54  ;;  %vm5473_vm7 = vcmask 523264   ;;  %v2102_v50 = vrot.slane %v2088_v58, %v3745_v17  ;;  %v2111_v23 = vrot.slane %v2103_v46, %v3759_v31 }
 0x22e   :  { %3048 = vrot.lane.b32.xlu1 %v1871_v1, %s3699_s19 }
 0x22f   :  { %v2821_v20 = vpop.permute.xlu0 %2820  ;;  %v2120_v8 = vcombine.high %v2087_v47, %v2102_v50 }
 0x230   :  { %v3431_v33 = vsel %vm5471_vm9, %v3430_v62, %v2821_v20  ;;  %v2825_v61 = vpop.permute.xlu1 %2824  ;;  %vm5474_vm9 = vcmask 556032   ;;  %v2135_v62 = vcombine.high %v2111_v23, %v3691_v27  ;;  %v2118_v20 = vrot.slane %v2104_v29, %v3759_v31 }
 0x231   :  { %3052 = vrot.lane.b32.xlu0 %v1854_v18, %s3700_s20  ;;  %v3432_v10 = vsel %vm5472_vm8, %v3431_v33, %v2825_v61  ;;  %vm5475_vm8 = vcmask 588800   ;;  %v2119_v18 = vcombine.low %v2087_v47, %v2102_v50  ;;  %v2134_v38 = vrot.slane %v2120_v8, %v3759_v31 }
 0x232   :  { %3056 = vrot.lane.b32.xlu1 %v1872_v51, %s3701_s21 }
 0x233   :  { %v2829_v21 = vpop.permute.xlu0 %2828  ;;  %v2127_v26 = vrot.slane %v2119_v18, %v3759_v31 }
 0x234   :  { %v3433_v30 = vsel %vm5473_vm7, %v3432_v10, %v2829_v21  ;;  %v2833_v25 = vpop.permute.xlu1 %2832  ;;  %vm5478_vm7 = vcmask 621568   ;;  %v5486_v21 = vld [vmem:[#allocation14_spill] sm:$0xff] }
 0x235   :  { %3060 = vrot.lane.b32.xlu0 %v1863_v39, %s3702_s22  ;;  %v3434_v28 = vsel %vm5474_vm9, %v3433_v30, %v2833_v25  ;;  %vm5480_vm9 = vcmask 654336   ;;  %v2136_v39 = vcombine.high %v2118_v20, %v3691_v27  ;;  %v1897_v63 = vrot.slane %v5486_v21, %v3745_v17  ;;  %v5487_v30 = vld [vmem:[#allocation19_spill] sm:$0xff] }
 0x236   :  { %3064 = vrot.lane.b32.xlu1 %v1873_v53, %s3703_s23  ;;  %v1882_v25 = vrot.slane %v5487_v30, %v3745_v17  ;;  %v1875_v46 = vcombine.high %v5487_v30, %v3691_v27 }
 0x237   :  { %v2837_v37 = vpop.permute.xlu0 %2836 }
 0x238   :  { %v3435_v57 = vsel %vm5475_vm8, %v3434_v28, %v2837_v37  ;;  %v2841_v22 = vpop.permute.xlu1 %2840  ;;  %vm5481_vm8 = vcmask 687104   ;;  %v2137_v37 = vcombine.high %v2127_v26, %v3691_v27  ;;  %v1905_v0 = vcombine.low %v1882_v25, %v1897_v63 }
 0x239   :  { %3068 = vrot.lane.b32.xlu0 %v4996_v4, %s5476_s9  ;;  %v3436_v45 = vsel %vm5478_vm7, %v3435_v57, %v2841_v22  ;;  %vm5482_vm7 = vcmask 719872   ;;  %v5488_v57 = vld [vmem:[#allocation22_spill] sm:$0xff]  ;;  %v1890_v4 = vcombine.high %v5486_v21, %v3691_v27 }
 0x23a   :  { %3140 = vrot.lane.b32.xlu1 %v2069_v11, %s3694_s14  ;;  %v2161_v22 = vrot.slane %v5488_v57, %v3745_v17  ;;  %v5489_v11 = vld [vmem:[#allocation26_spill] sm:$0xff]  ;;  %v1913_v43 = vrot.slane %v1905_v0, %v3759_v31  ;;  %v2154_v47 = vcombine.high %v5488_v57, %v3691_v27  ;;  %v5497_v0 = vld [vmem:[#allocation16_spill] sm:$0xff] }
 0x23b   :  { %v2845_v15 = vpop.permute.xlu0 %2844 }
 0x23c   :  { %v3437_v2 = vsel %vm5480_vm9, %v3436_v45, %v2845_v15  ;;  %v2849_v32 = vpop.permute.xlu1 %2848  ;;  %vm5483_vm9 = vcmask 752640  }
 0x23d   :  { %3144 = vrot.lane.b32.xlu0 %v2052_v13, %s3688_s10  ;;  %v3438_v52 = vsel %vm5481_vm8, %v3437_v2, %v2849_v32  ;;  %vm5484_vm8 = vcmask 785408   ;;  %v2146_v13 = vrot.slane %v5489_v11, %v3745_v17  ;;  %s5512_s10 = smov 124  }
 0x23e   :  { %3148 = vrot.lane.b32.xlu1 %v2070_v5, %s3692_s0  ;;  %v2138_v5 = vcombine.high %v2134_v38, %v3691_v27  ;;  %s3722_s0 = smov [#allocation5]  }
 0x23f   :  { %v2853_v59 = vpop.permute.xlu0 %2852  ;;  %v2169_v2 = vcombine.low %v2146_v13, %v2161_v22 }
 0x240   :  { %v3439_v19 = vsel %vm5482_vm7, %v3438_v52, %v2853_v59  ;;  %v2857_v44 = vpop.permute.xlu1 %2856  ;;  %vm5485_vm7 = vcmask 818176  }
 0x241   :  { %3152 = vrot.lane.b32.xlu0 %v2061_v42, %s3693_s13  ;;  %v3440_v55 = vsel %vm5483_vm9, %v3439_v19, %v2857_v44  ;;  %v2177_v59 = vrot.slane %v2169_v2, %v3759_v31  ;;  %v1906_v19 = vcombine.high %v1882_v25, %v1897_v63  ;;  %vm5490_vm9 = vcmask 261120   ;;  %s3594_s13 = sshll.u32 %s3722_s0, 4  ;;  %s3595_s13 = int_to_ptr.vmem [resolvable:$true] %s3594_s13 }
 0x242   :  { %3156 = vrot.lane.b32.xlu1 %v2071_v24, %s3695_s15  ;;  %s3662_s14 = scalar_lea.vmem %s3595_s13, 256  ;;  %p3667_p6 = scmp.lt.s32.totalorder %s3595_s13, %s3595_s13 }
 0x243   :  { %v2861_v48 = vpop.permute.xlu0 %2860  ;;  %p3663_p5 = scmp.ne.s32.totalorder %s3595_s13, %s3662_s14  ;;  %p3668_p7 = scmp.lt.s32.totalorder %s3662_s14, %s3662_s14 }
 0x244   :  { %v3441_v34 = vsel %vm5484_vm8, %v3440_v55, %v2861_v48  ;;  %v2865_v60 = vpop.permute.xlu1 %2864  ;;  %v2139_v55 = vcombine.high %v5489_v11, %v3691_v27  ;;  %v2170_v48 = vcombine.high %v2146_v13, %v2161_v22  ;;  %vm5491_vm8 = vcmask 293888  }
 0x245   :  { %3160 = vrot.lane.b32.xlu0 %v2068_v16, %s3696_s16  ;;  %v3442_v54 = vsel %vm5485_vm7, %v3441_v34, %v2865_v60  ;;  %v1937_v16 = vcombine.high %v1913_v43, %v3691_v27  ;;  %v2201_v34 = vcombine.high %v2177_v59, %v3691_v27  ;;  %v1904_v60 = vrot.slane %v1890_v4, %v3745_v17  ;;  %p3669_p8 = por %p3668_p7, %p3667_p6 }
 0x246   :  { %3164 = vrot.lane.b32.xlu1 %v2072_v56, %s3697_s17  ;;  %v1889_v56 = vrot.slane %v1875_v46, %v3745_v17  ;;  %vm5492_vm7 = vcmask 326656  }
 0x247   :  { %v2869_v1 = vpop.permute.xlu0 %2868  ;;  %p3670_p9 = pnand %p3669_p8, %p3663_p5 }
 0x248   :  { %v3443_v35 = vsel %vm3313_vm13, %v3442_v54, %v2869_v1  ;;  %v2873_v12 = vpop.permute.xlu1 %2872  ;;  %v1920_v1 = vrot.slane %v1906_v19, %v3759_v31 }
 0x249   :  { %3168 = vrot.lane.b32.xlu0 %v2111_v23, %s3698_s18  ;;  %v3444_v41 = vsel %vm3315_vm14, %v3443_v35, %v2873_v12  ;;  %v2168_v35 = vrot.slane %v2154_v47, %v3745_v17  ;;  %v2153_v12 = vrot.slane %v2139_v55, %v3745_v17 }
 0x24a   :  { %3172 = vrot.lane.b32.xlu1 %v2135_v62, %s3699_s19 }
 0x24b   :  { %v2877_v33 = vpop.permute.xlu0 %2876  ;;  %v2186_v13 = vcombine.high %v2153_v12, %v2168_v35 }
 0x24c   :  { %v3445_v61 = vsel %vm3317_vm12, %v3444_v41, %v2877_v33  ;;  %v2881_v51 = vpop.permute.xlu1 %2880  ;;  %v1921_v41 = vcombine.low %v1889_v56, %v1904_v60 }
 0x24d   :  { %v3446_v40 = vsel %vm5330_vm10, %v3445_v61, %v2881_v51  ;;  %3176 = vrot.lane.b32.xlu0 %v2118_v20, %s3700_s20  ;;  %v2184_v20 = vrot.slane %v2170_v48, %v3759_v31  ;;  %v1938_v51 = vcombine.high %v1920_v1, %v3691_v27 }
 0x24e   :  { %3180 = vrot.lane.b32.xlu1 %v2136_v39, %s3701_s21  ;;  %v1929_v63 = vrot.slane %v1921_v41, %v3759_v31 }
 0x24f   :  { %v2885_v10 = vpop.permute.xlu0 %2884  ;;  %v2202_v8 = vcombine.high %v2184_v20, %v3691_v27 }
 0x250   :  { %v3447_v53 = vsel %vm5329_vm15, %v3446_v40, %v2885_v10  ;;  %v2889_v28 = vpop.permute.xlu1 %2888  ;;  %v1939_v22 = vcombine.high %v1929_v63, %v3691_v27 }
 0x251   :  { %v5053_v9 = vsel %vm5328_vm11, %v3447_v53, %v2889_v28  ;;  %3184 = vrot.lane.b32.xlu0 %v2127_v26, %s3702_s22  ;;  %v2185_v26 = vcombine.low %v2153_v12, %v2168_v35  ;;  %v1922_v28 = vcombine.high %v1889_v56, %v1904_v60  ;;  %v1956_v60 = vcombine.high %v5497_v0, %v3691_v27 }
 0x252   :  { %3188 = vrot.lane.b32.xlu1 %v2137_v37, %s3703_s23 }
 0x253   :  { %v2893_v36 = vpop.permute.xlu0 %2892  ;;  %v2193_v53 = vrot.slane %v2185_v26, %v3759_v31 }
 0x254   :  { %v3449_v45 = vsel %vm3263_vm0, %v4602_v7, %v2893_v36  ;;  %v2897_v15 = vpop.permute.xlu1 %2896 }
 0x255   :  { %v3450_v6 = vsel %vm3265_vm1, %v3449_v45, %v2897_v15  ;;  %3192 = vrot.lane.b32.xlu0 %v2134_v38, %s5476_s9  ;;  %v2203_v38 = vcombine.high %v2193_v53, %v3691_v27  ;;  %v1963_v45 = vrot.slane %v5497_v0, %v3745_v17  ;;  %v5498_v15 = vld [vmem:[#allocation21_spill] sm:$0xff] }
 0x256   :  { %3072 = vrot.lane.b32.xlu1 %v1874_v3, %s5432_s24  ;;  %v1948_v3 = vrot.slane %v5498_v15, %v3745_v17 }
 0x257   :  { %v2901_v32 = vpop.permute.xlu0 %2900 }
 0x258   :  { %v3451_v42 = vsel %vm3267_vm2, %v3450_v6, %v2901_v32  ;;  %v2905_v58 = vpop.permute.xlu1 %2904  ;;  %v1936_v32 = vrot.slane %v1922_v28, %v3759_v31 }
 0x259   :  { %v3452_v7 = vsel %vm3269_vm3, %v3451_v42, %v2905_v58  ;;  %3196 = vrot.lane.b32.xlu0 %v2138_v5, %s5432_s24  ;;  %v5501_v42 = vld [vmem:[#allocation24_spill] sm:$0xff] }
 0x25a   :  { %3076 = vrot.lane.b32.xlu1 %v1913_v43, %s3706_s26  ;;  %v2227_v58 = vrot.slane %v5501_v42, %v3745_v17  ;;  %v5502_v43 = vld [vmem:[#allocation27_spill] sm:$0xff] }
 0x25b   :  { %v2909_v52 = vpop.permute.xlu0 %2908  ;;  %v2205_v41 = vcombine.high %v5502_v43, %v3691_v27 }
 0x25c   :  { %v3453_v44 = vsel %vm3271_vm4, %v3452_v7, %v2909_v52  ;;  %v2913_v24 = vpop.permute.xlu1 %2912  ;;  %v2212_v7 = vrot.slane %v5502_v43, %v3745_v17  ;;  %v2200_v52 = vrot.slane %v2186_v13, %v3759_v31 }
 0x25d   :  { %v3454_v50 = vsel %vm3273_vm5, %v3453_v44, %v2913_v24  ;;  %3200 = vrot.lane.b32.xlu0 %v2177_v59, %s3706_s26  ;;  %v1971_v59 = vcombine.low %v1948_v3, %v1963_v45  ;;  %v1940_v44 = vcombine.high %v1936_v32, %v3691_v27 }
 0x25e   :  { %3080 = vrot.lane.b32.xlu1 %v1937_v16, %s3707_s27  ;;  %v2235_v16 = vcombine.low %v2212_v7, %v2227_v58  ;;  %v2204_v47 = vcombine.high %v2200_v52, %v3691_v27 }
 0x25f   :  { %v2917_v29 = vpop.permute.xlu0 %2916 }
 0x260   :  { %v3455_v23 = vsel %vm5327_vm6, %v3454_v50, %v2917_v29  ;;  %v2921_v54 = vpop.permute.xlu1 %2920  ;;  %vm5494_vm6 = vcmask 392192   ;;  %v1979_v29 = vrot.slane %v1971_v59, %v3759_v31 }
 0x261   :  { %v3456_v18 = vsel %vm5490_vm9, %v3455_v23, %v2921_v54  ;;  %3204 = vrot.lane.b32.xlu0 %v2201_v34, %s3707_s27  ;;  %vm5493_vm9 = vcmask 359424   ;;  %v2243_v23 = vrot.slane %v2235_v16, %v3759_v31  ;;  %v1941_v54 = vcombine.high %v5498_v15, %v3691_v27 }
 0x262   :  { %3084 = vrot.lane.b32.xlu1 %v1920_v1, %s5403_s25  ;;  %v1972_v1 = vcombine.high %v1948_v3, %v1963_v45  ;;  %v2003_v12 = vcombine.high %v1979_v29, %v3691_v27 }
 0x263   :  { %v2925_v62 = vpop.permute.xlu0 %2924  ;;  %v1955_v26 = vrot.slane %v1941_v54, %v3745_v17 }
 0x264   :  { %v3457_v33 = vsel %vm5491_vm8, %v3456_v18, %v2925_v62  ;;  %v2929_v61 = vpop.permute.xlu1 %2928  ;;  %vm5495_vm8 = vcmask 424960  }
 0x265   :  { %v3458_v39 = vsel %vm5492_vm7, %v3457_v33, %v2929_v61  ;;  %3208 = vrot.lane.b32.xlu0 %v2184_v20, %s5403_s25  ;;  %vm5496_vm7 = vcmask 457728   ;;  %v2220_v20 = vcombine.high %v5501_v42, %v3691_v27  ;;  %v2236_v33 = vcombine.high %v2212_v7, %v2227_v58 }
 0x266   :  { %3088 = vrot.lane.b32.xlu1 %v1938_v51, %s3709_s29  ;;  %v2267_v51 = vcombine.high %v2243_v23, %v3691_v27 }
 0x267   :  { %v2933_v40 = vpop.permute.xlu0 %2932 }
 0x268   :  { %v3459_v10 = vsel %vm5493_vm9, %v3458_v39, %v2933_v40  ;;  %v2937_v21 = vpop.permute.xlu1 %2936  ;;  %vm5500_vm9 = vcmask 523264   ;;  %v1970_v39 = vrot.slane %v1956_v60, %v3745_v17 }
 0x269   :  { %v3460_v30 = vsel %vm5494_vm6, %v3459_v10, %v2937_v21  ;;  %3212 = vrot.lane.b32.xlu0 %v2202_v8, %s3709_s29  ;;  %vm5499_vm6 = vcmask 490496   ;;  %v1986_v10 = vrot.slane %v1972_v1, %v3759_v31 }
 0x26a   :  { %3092 = vrot.lane.b32.xlu1 %v1929_v63, %s3710_s30  ;;  %v2234_v63 = vrot.slane %v2220_v20, %v3745_v17  ;;  %v1987_v28 = vcombine.low %v1955_v26, %v1970_v39 }
 0x26b   :  { %v2941_v25 = vpop.permute.xlu0 %2940 }
 0x26c   :  { %v3461_v37 = vsel %vm5495_vm8, %v3460_v30, %v2941_v25  ;;  %v2945_v57 = vpop.permute.xlu1 %2944  ;;  %vm5503_vm8 = vcmask 556032   ;;  %v2219_v30 = vrot.slane %v2205_v41, %v3745_v17  ;;  %v1995_v15 = vrot.slane %v1987_v28, %v3759_v31 }
 0x26d   :  { %v3462_v11 = vsel %vm5496_vm7, %v3461_v37, %v2945_v57  ;;  %3216 = vrot.lane.b32.xlu0 %v2193_v53, %s3710_s30  ;;  %vm5504_vm7 = vcmask 588800   ;;  %v2250_v53 = vrot.slane %v2236_v33, %v3759_v31 }
 0x26e   :  { %3096 = vrot.lane.b32.xlu1 %v1939_v22, %s5386_s28  ;;  %v2004_v22 = vcombine.high %v1986_v10, %v3691_v27  ;;  %v2251_v13 = vcombine.low %v2219_v30, %v2234_v63  ;;  %v2005_v58 = vcombine.high %v1995_v15, %v3691_v27  ;;  %v2252_v7 = vcombine.high %v2219_v30, %v2234_v63 }
 0x26f   :  { %v2949_v36 = vpop.permute.xlu0 %2948 }
 0x270   :  { %v3463_v6 = vsel %vm5499_vm6, %v3462_v11, %v2949_v36  ;;  %v2953_v2 = vpop.permute.xlu1 %2952  ;;  %vm5505_vm6 = vcmask 621568  }
 0x271   :  { %v3464_v5 = vsel %vm5500_vm9, %v3463_v6, %v2953_v2  ;;  %3220 = vrot.lane.b32.xlu0 %v2203_v38, %s5386_s28  ;;  %vm5506_vm9 = vcmask 654336   ;;  %v2268_v38 = vcombine.high %v2250_v53, %v3691_v27  ;;  %v2259_v2 = vrot.slane %v2251_v13, %v3759_v31 }
 0x272   :  { %3100 = vrot.lane.b32.xlu1 %v1936_v32, %s3712_s3  ;;  %v1988_v32 = vcombine.high %v1955_v26, %v1970_v39 }
 0x273   :  { %v2957_v4 = vpop.permute.xlu0 %2956 }
 0x274   :  { %v3465_v46 = vsel %vm5503_vm8, %v3464_v5, %v2957_v4  ;;  %v2961_v19 = vpop.permute.xlu1 %2960  ;;  %vm5507_vm8 = vcmask 687104  }
 0x275   :  { %v3466_v24 = vsel %vm5504_vm7, %v3465_v46, %v2961_v19  ;;  %3224 = vrot.lane.b32.xlu0 %v2200_v52, %s3712_s3  ;;  %vm5508_vm7 = vcmask 719872   ;;  %v2269_v52 = vcombine.high %v2259_v2, %v3691_v27  ;;  %v2002_v19 = vrot.slane %v1988_v32, %v3759_v31 }
 0x276   :  { %3104 = vrot.lane.b32.xlu1 %v1940_v44, %s3713_s4 }
 0x277   :  { %v2965_v50 = vpop.permute.xlu0 %2964 }
 0x278   :  { %v3467_v55 = vsel %vm5505_vm6, %v3466_v24, %v2965_v50  ;;  %v2969_v48 = vpop.permute.xlu1 %2968  ;;  %vm5509_vm6 = vcmask 752640   ;;  %v2266_v50 = vrot.slane %v2252_v7, %v3759_v31 }
 0x279   :  { %v3468_v34 = vsel %vm5506_vm9, %v3467_v55, %v2969_v48  ;;  %3228 = vrot.lane.b32.xlu0 %v2204_v47, %s3713_s4  ;;  %vm5510_vm9 = vcmask 785408   ;;  %v2006_v48 = vcombine.high %v2002_v19, %v3691_v27 }
 0x27a   :  { %3108 = vrot.lane.b32.xlu1 %v1979_v29, %s5369_s2  ;;  %v2270_v60 = vcombine.high %v2266_v50, %v3691_v27 }
 0x27b   :  { %v2973_v56 = vpop.permute.xlu0 %2972 }
 0x27c   :  { %v3469_v18 = vsel %vm5507_vm8, %v3468_v34, %v2973_v56  ;;  %v2977_v35 = vpop.permute.xlu1 %2976  ;;  %vm5511_vm8 = vcmask 818176  }
 0x27d   :  { %v3470_v62 = vsel %vm5508_vm7, %v3469_v18, %v2977_v35  ;;  %3232 = vrot.lane.b32.xlu0 %v2243_v23, %s5369_s2  ;;  %vm5513_vm7 = vcmask 228352  }
 0x27e   :  { %3112 = vrot.lane.b32.xlu1 %v2003_v12, %s3715_s6 }
 0x27f   :  { %v2981_v61 = vpop.permute.xlu0 %2980 }
 0x280   :  { %v3471_v40 = vsel %vm5509_vm6, %v3470_v62, %v2981_v61  ;;  %v2985_v8 = vpop.permute.xlu1 %2984  ;;  %vm5514_vm6 = vcmask 261120  }
 0x281   :  { %v3472_v21 = vsel %vm5510_vm9, %v3471_v40, %v2985_v8  ;;  %3236 = vrot.lane.b32.xlu0 %v2267_v51, %s3715_s6  ;;  %vm5515_vm9 = vcmask 293888  }
 0x282   :  { %3116 = vrot.lane.b32.xlu1 %v1986_v10, %s3716_s7 }
 0x283   :  { %v2989_v25 = vpop.permute.xlu0 %2988 }
 0x284   :  { %v3473_v37 = vsel %vm5511_vm8, %v3472_v21, %v2989_v25  ;;  %v2993_v57 = vpop.permute.xlu1 %2992  ;;  %vm5516_vm8 = vcmask 326656  }
 0x285   :  { %v3474_v11 = vsel %vm3313_vm13, %v3473_v37, %v2993_v57  ;;  %3240 = vrot.lane.b32.xlu0 %v2250_v53, %s3716_s7 }
 0x286   :  { %3120 = vrot.lane.b32.xlu1 %v2004_v22, %s3717_s8 }
 0x287   :  { %v2997_v36 = vpop.permute.xlu0 %2996 }
 0x288   :  { %v3475_v0 = vsel %vm3315_vm14, %v3474_v11, %v2997_v36  ;;  %v3001_v45 = vpop.permute.xlu1 %3000 }
 0x289   :  { %v3476_v3 = vsel %vm3317_vm12, %v3475_v0, %v3001_v45  ;;  %3244 = vrot.lane.b32.xlu0 %v2268_v38, %s3717_s8 }
 0x28a   :  { %3124 = vrot.lane.b32.xlu1 %v1995_v15, %s5350_s5 }
 0x28b   :  { %v3005_v6 = vpop.permute.xlu0 %3004 }
 0x28c   :  { %v3477_v5 = vsel %vm5330_vm10, %v3476_v3, %v3005_v6  ;;  %v3009_v42 = vpop.permute.xlu1 %3008  ;;  %vm5519_vm10 = vcmask 424960  }
 0x28d   :  { %v3478_v43 = vsel %vm5329_vm15, %v3477_v5, %v3009_v42  ;;  %3248 = vrot.lane.b32.xlu0 %v2259_v2, %s5350_s5  ;;  %vm5518_vm15 = vcmask 392192  }
 0x28e   :  { %3128 = vrot.lane.b32.xlu1 %v2005_v58, %s3719_s11 }
 0x28f   :  { %v3013_v4 = vpop.permute.xlu0 %3012 }
 0x290   :  { %v5187_v59 = vsel %vm5328_vm11, %v3478_v43, %v3013_v4  ;;  %v3017_v46 = vpop.permute.xlu1 %3016  ;;  %vm5517_vm11 = vcmask 359424  }
 0x291   :  { %v3567_v44 = vcombine.low %v5053_v9, %v5187_v59  ;;  %3252 = vrot.lane.b32.xlu0 %v2269_v52, %s3719_s11  ;;  %v3480_v24 = vsel %vm3263_vm0, %v4923_v49, %v3017_v46 }
 0x292   :  { %3132 = vrot.lane.b32.xlu1 %v2002_v19, %s3720_s12 }
 0x293   :  { %v3021_v16 = vpop.permute.xlu0 %3020 }
 0x294   :  { %v3481_v47 = vsel %vm3265_vm1, %v3480_v24, %v3021_v16  ;;  %v3025_v55 = vpop.permute.xlu1 %3024 }
 0x295   :  { %v3482_v29 = vsel %vm3267_vm2, %v3481_v47, %v3025_v55  ;;  %3256 = vrot.lane.b32.xlu0 %v2266_v50, %s3720_s12 }
 0x296   :  { %3136 = vrot.lane.b32.xlu1 %v2006_v48, %s5512_s10 }
 0x297   :  { %v3029_v34 = vpop.permute.xlu0 %3028 }
 0x298   :  { %v3483_v56 = vsel %vm3269_vm3, %v3482_v29, %v3029_v34  ;;  %v3033_v49 = vpop.permute.xlu1 %3032 }
 0x299   :  { %v3484_v23 = vsel %vm3271_vm4, %v3483_v56, %v3033_v49  ;;  %3260 = vrot.lane.b32.xlu0 %v2270_v60, %s5512_s10 }
 0x29b   :  { %v3037_v31 = vpop.permute.xlu0 %3036 }
 0x29c   :  { %v3485_v54 = vsel %vm3273_vm5, %v3484_v23, %v3037_v31  ;;  %v3041_v1 = vpop.permute.xlu1 %3040 }
 0x29d   :  { %v3486_v18 = vsel %vm5513_vm7, %v3485_v54, %v3041_v1  ;;  %vm5520_vm7 = vcmask 457728  }
 0x29f   :  { %v3045_v35 = vpop.permute.xlu0 %3044 }
 0x2a0   :  { %v3487_v12 = vsel %vm5514_vm6, %v3486_v18, %v3045_v35  ;;  %v3049_v62 = vpop.permute.xlu1 %3048 }
 0x2a1   :  { %v3488_v20 = vsel %vm5515_vm9, %v3487_v12, %v3049_v62 }
 0x2a3   :  { %v3053_v27 = vpop.permute.xlu0 %3052 }
 0x2a4   :  { %v3489_v41 = vsel %vm5516_vm8, %v3488_v20, %v3053_v27  ;;  %v3057_v33 = vpop.permute.xlu1 %3056 }
 0x2a5   :  { %v3490_v61 = vsel %vm5517_vm11, %v3489_v41, %v3057_v33  ;;  %vm5522_vm11 = vmmov %vm5514_vm6 }
 0x2a7   :  { %v3061_v51 = vpop.permute.xlu0 %3060 }
 0x2a8   :  { %v3491_v39 = vsel %vm5518_vm15, %v3490_v61, %v3061_v51  ;;  %v3065_v26 = vpop.permute.xlu1 %3064 }
 0x2a9   :  { %v3492_v40 = vsel %vm5519_vm10, %v3491_v39, %v3065_v26  ;;  %vm5521_vm10 = vcmask 228352  }
 0x2ab   :  { %v3069_v8 = vpop.permute.xlu0 %3068 }
 0x2ac   :  { %v3493_v10 = vsel %vm5520_vm7, %v3492_v40, %v3069_v8  ;;  %v3141_v21 = vpop.permute.xlu1 %3140 }
 0x2ad   :  { %v3511_v46 = vsel %vm3263_vm0, %v4988_v14, %v3141_v21  ;;  %vm5523_vm0 = vmmov %vm5515_vm9  ;;  %vm5531_vm9 = vcmask 523264  }
 0x2af   :  { %v3145_v63 = vpop.permute.xlu0 %3144 }
 0x2b0   :  { %v3149_v30 = vpop.permute.xlu1 %3148  ;;  %v3512_v19 = vsel %vm3265_vm1, %v3511_v46, %v3145_v63  ;;  %vm5524_vm1 = vmmov %vm5516_vm8 }
 0x2b1   :  { %v3513_v50 = vsel %vm3267_vm2, %v3512_v19, %v3149_v30  ;;  %vm5525_vm2 = vcmask 359424   ;;  %vm5532_vm8 = vmmov %vm5531_vm9 }
 0x2b3   :  { %v3153_v25 = vpop.permute.xlu0 %3152 }
 0x2b4   :  { %v3157_v53 = vpop.permute.xlu1 %3156  ;;  %v3514_v47 = vsel %vm3269_vm3, %v3513_v50, %v3153_v25  ;;  %vm5526_vm3 = vmmov %vm5518_vm15  ;;  %vm5529_vm15 = vcmask 490496  }
 0x2b5   :  { %v3515_v29 = vsel %vm3271_vm4, %v3514_v47, %v3157_v53  ;;  %vm5527_vm4 = vcmask 424960   ;;  %vm5530_vm6 = vmmov %vm5529_vm15 }
 0x2b7   :  { %v3161_v28 = vpop.permute.xlu0 %3160 }
 0x2b8   :  { %v3165_v37 = vpop.permute.xlu1 %3164  ;;  %v3516_v34 = vsel %vm3273_vm5, %v3515_v29, %v3161_v28  ;;  %vm5528_vm5 = vmmov %vm5520_vm7  ;;  %vm5533_vm7 = vcmask 556032  }
 0x2b9   :  { %v3517_v49 = vsel %vm5521_vm10, %v3516_v34, %v3165_v37  ;;  %vm5534_vm10 = vmmov %vm5533_vm7 }
 0x2bb   :  { %v3169_v57 = vpop.permute.xlu0 %3168 }
 0x2bc   :  { %v3173_v22 = vpop.permute.xlu1 %3172  ;;  %v3518_v14 = vsel %vm5522_vm11, %v3517_v49, %v3169_v57  ;;  %vm5535_vm11 = vcmask 588800  }
 0x2bd   :  { %v3519_v54 = vsel %vm5523_vm0, %v3518_v14, %v3173_v22  ;;  %vm5536_vm0 = vmmov %vm5535_vm11 }
 0x2bf   :  { %v3177_v11 = vpop.permute.xlu0 %3176 }
 0x2c0   :  { %v3181_v13 = vpop.permute.xlu1 %3180  ;;  %v3520_v1 = vsel %vm5524_vm1, %v3519_v54, %v3177_v11  ;;  %vm5537_vm1 = vcmask 621568  }
 0x2c1   :  { %v3521_v12 = vsel %vm5525_vm2, %v3520_v1, %v3181_v13  ;;  %vm5538_vm2 = vmmov %vm5537_vm1 }
 0x2c3   :  { %v3185_v36 = vpop.permute.xlu0 %3184 }
 0x2c4   :  { %v3189_v38 = vpop.permute.xlu1 %3188  ;;  %v3522_v62 = vsel %vm5526_vm3, %v3521_v12, %v3185_v36  ;;  %vm5539_vm3 = vcmask 654336  }
 0x2c5   :  { %v3523_v41 = vsel %vm5527_vm4, %v3522_v62, %v3189_v38  ;;  %vm5540_vm4 = vmmov %vm5539_vm3 }
 0x2c7   :  { %v3193_v0 = vpop.permute.xlu0 %3192 }
 0x2c8   :  { %v3073_v45 = vpop.permute.xlu1 %3072  ;;  %v3524_v33 = vsel %vm5528_vm5, %v3523_v41, %v3193_v0  ;;  %vm5541_vm5 = vcmask 687104  }
 0x2c9   :  { %v3494_v51 = vsel %vm5529_vm15, %v3493_v10, %v3073_v45  ;;  %vm5542_vm15 = vmmov %vm5541_vm5 }
 0x2cb   :  { %v3197_v15 = vpop.permute.xlu0 %3196 }
 0x2cc   :  { %v3077_v3 = vpop.permute.xlu1 %3076  ;;  %v3525_v39 = vsel %vm5530_vm6, %v3524_v33, %v3197_v15  ;;  %vm5543_vm6 = vcmask 719872  }
 0x2cd   :  { %v3495_v40 = vsel %vm5531_vm9, %v3494_v51, %v3077_v3  ;;  %vm5544_vm9 = vmmov %vm5543_vm6 }
 0x2cf   :  { %v3201_v6 = vpop.permute.xlu0 %3200 }
 0x2d0   :  { %v3081_v2 = vpop.permute.xlu1 %3080  ;;  %v3526_v8 = vsel %vm5532_vm8, %v3525_v39, %v3201_v6  ;;  %vm5545_vm8 = vcmask 752640  }
 0x2d1   :  { %v3496_v21 = vsel %vm5533_vm7, %v3495_v40, %v3081_v2  ;;  %vm5546_vm7 = vmmov %vm5545_vm8 }
 0x2d3   :  { %v3205_v32 = vpop.permute.xlu0 %3204 }
 0x2d4   :  { %v3085_v5 = vpop.permute.xlu1 %3084  ;;  %v3527_v63 = vsel %vm5534_vm10, %v3526_v8, %v3205_v32  ;;  %vm5547_vm10 = vcmask 785408  }
 0x2d5   :  { %v3497_v30 = vsel %vm5535_vm11, %v3496_v21, %v3085_v5  ;;  %vm5548_vm11 = vmmov %vm5547_vm10 }
 0x2d7   :  { %v3209_v42 = vpop.permute.xlu0 %3208 }
 0x2d8   :  { %v3089_v58 = vpop.permute.xlu1 %3088  ;;  %v3528_v25 = vsel %vm5536_vm0, %v3527_v63, %v3209_v42  ;;  %vm5549_vm0 = vcmask 818176  }
 0x2d9   :  { %v3498_v28 = vsel %vm5537_vm1, %v3497_v30, %v3089_v58  ;;  %vm5550_vm1 = vmmov %vm5549_vm0 }
 0x2db   :  { %v3213_v43 = vpop.permute.xlu0 %3212 }
 0x2dc   :  { %v3093_v7 = vpop.permute.xlu1 %3092  ;;  %v3529_v10 = vsel %vm5538_vm2, %v3528_v25, %v3213_v43  ;;  %vm5551_vm2 = vcmask 949248  }
 0x2dd   :  { %v3499_v57 = vsel %vm5539_vm3, %v3498_v28, %v3093_v7  ;;  %vm5552_vm3 = vmmov %vm5551_vm2 }
 0x2df   :  { %v3217_v4 = vpop.permute.xlu0 %3216 }
 0x2e0   :  { %v3097_v52 = vpop.permute.xlu1 %3096  ;;  %v3530_v22 = vsel %vm5540_vm4, %v3529_v10, %v3217_v4  ;;  %vm5553_vm4 = vcmask 982016  }
 0x2e1   :  { %v3500_v11 = vsel %vm5541_vm5, %v3499_v57, %v3097_v52  ;;  %vm5554_vm5 = vmmov %vm5553_vm4 }
 0x2e3   :  { %v3221_v24 = vpop.permute.xlu0 %3220 }
 0x2e4   :  { %v3101_v16 = vpop.permute.xlu1 %3100  ;;  %v3531_v13 = vsel %vm5542_vm15, %v3530_v22, %v3221_v24 }
 0x2e5   :  { %v3501_v36 = vsel %vm5543_vm6, %v3500_v11, %v3101_v16 }
 0x2e7   :  { %v3225_v55 = vpop.permute.xlu0 %3224 }
 0x2e8   :  { %v3105_v48 = vpop.permute.xlu1 %3104  ;;  %v3532_v38 = vsel %vm5544_vm9, %v3531_v13, %v3225_v55 }
 0x2e9   :  { %v3502_v45 = vsel %vm5545_vm8, %v3501_v36, %v3105_v48 }
 0x2eb   :  { %v3229_v60 = vpop.permute.xlu0 %3228 }
 0x2ec   :  { %v3109_v56 = vpop.permute.xlu1 %3108  ;;  %v3533_v15 = vsel %vm5546_vm7, %v3532_v38, %v3229_v60  ;;  %v3575_v60 = vrot.slane %v3567_v44, %v3745_v17 }
 0x2ed   :  { %v3503_v6 = vsel %vm5547_vm10, %v3502_v45, %v3109_v56 }
 0x2ef   :  { %v3233_v23 = vpop.permute.xlu0 %3232 }
 0x2f0   :  { %v3113_v31 = vpop.permute.xlu1 %3112  ;;  %v3534_v2 = vsel %vm5548_vm11, %v3533_v15, %v3233_v23 }
 0x2f1   :  { %v3504_v32 = vsel %vm5549_vm0, %v3503_v6, %v3113_v31 }
 0x2f3   :  { %v3237_v18 = vpop.permute.xlu0 %3236 }
 0x2f4   :  { %v3117_v35 = vpop.permute.xlu1 %3116  ;;  %v3535_v5 = vsel %vm5550_vm1, %v3534_v2, %v3237_v18 }
 0x2f5   :  { %v3505_v42 = vsel %vm3313_vm13, %v3504_v32, %v3117_v35 }
 0x2f7   :  { %v3241_v20 = vpop.permute.xlu0 %3240 }
 0x2f8   :  { %v3121_v27 = vpop.permute.xlu1 %3120  ;;  %v3536_v58 = vsel %vm3313_vm13, %v3535_v5, %v3241_v20  ;;  %vm5555_vm13 = vcmask 1014784  }
 0x2f9   :  { %v3506_v7 = vsel %vm3315_vm14, %v3505_v42, %v3121_v27  ;;  %vm5556_vm15 = vmmov %vm5555_vm13 }
 0x2fb   :  { %v3245_v61 = vpop.permute.xlu0 %3244 }
 0x2fc   :  { %v3125_v26 = vpop.permute.xlu1 %3124  ;;  %v3537_v4 = vsel %vm3315_vm14, %v3536_v58, %v3245_v61 }
 0x2fd   :  { %v3507_v52 = vsel %vm3317_vm12, %v3506_v7, %v3125_v26 }
 0x2ff   :  { %v3249_v53 = vpop.permute.xlu0 %3248 }
 0x300   :  { %v3129_v37 = vpop.permute.xlu1 %3128  ;;  %v3538_v46 = vsel %vm3317_vm12, %v3537_v4, %v3249_v53 }
 0x301   :  { %v3508_v24 = vsel %vm5551_vm2, %v3507_v52, %v3129_v37 }
 0x303   :  { %v3253_v0 = vpop.permute.xlu0 %3252 }
 0x304   :  { %v3133_v3 = vpop.permute.xlu1 %3132  ;;  %v3539_v16 = vsel %vm5552_vm3, %v3538_v46, %v3253_v0 }
 0x305   :  { %v3509_v50 = vsel %vm5553_vm4, %v3508_v24, %v3133_v3 }
 0x307   :  { %v3257_v43 = vpop.permute.xlu0 %3256 }
 0x308   :  { %v3137_v19 = vpop.permute.xlu1 %3136  ;;  %v3540_v47 = vsel %vm5554_vm5, %v3539_v16, %v3257_v43 }
 0x309   :  { %v3510_v48 = vsel %vm5555_vm13, %v3509_v50, %v3137_v19 }
 0x30b   :  { %v3261_v55 = vpop.permute.xlu0 %3260 }
 0x30c   :  { %v3541_v29 = vsel %vm5556_vm15, %v3540_v47, %v3261_v55 }
 0x30d   :  { %v3568_v34 = vcombine.low %v3510_v48, %v3541_v29 }
 0x30f   :  { %v3582_v56 = vrot.slane %v3568_v34, %v3745_v17 }
 0x311   :  { %v3583_v49 = vcombine.low %v3575_v60, %v3582_v56 }
 0x313   :  { %3587 = vst [vmem:[#allocation5 + $0x8] sm:$0xff] %v3583_v49 }
 0x314   :  { %3673 = shalt.err (!%p3670_p9)
}
 0x315   :  { %3597 = dma.vmem_to_hbm [thread:$0]  %s3595_s13, 256, %s5273_s1, [#allocation4]  }
 0x316   :  { %3684 = dma.done.wait [#allocation4], 256  }
 0x317   :  { %3685 = vsyncadd [#allocation4], 4294967040 }
 0x318   :  { %3601 = vsyncpa [#allocation3], 1 }
 0x319   :  { %3602 = vsyncpa [#allocation4], 1 }

</bundles_post_ra>
